<compile_context>
chip_gen: v6e
topology: v6e:2x2x1
jax: 0.10.0
libtpu: 0.0.40
codegen_flags: <defaults>
</compile_context>

<pallas_src>
import functools

import jax
import jax.numpy as jnp
import numpy as np
from jax.experimental import pallas as pl
from jax.experimental.pallas import tpu as pltpu


def attention_block2_kernel(x1_ref, x2_ref, gamma_ref, beta_ref,
                            wq_ref, bq_ref, wk_ref, bk_ref, wv_ref, bv_ref,
                            wp_ref, bp_ref, o_ref, kh_ref, vh_ref,
                            *, num_heads, head_dim, eps):
    gamma = gamma_ref[...]    # (1, C) f32
    beta = beta_ref[...]      # (1, C) f32

    def layer_norm(x):        # f32 math (row-wise)
        mu = jnp.mean(x, axis=-1, keepdims=True)
        var = jnp.mean(jnp.square(x - mu), axis=-1, keepdims=True)
        return (x - mu) * jax.lax.rsqrt(var + eps) * gamma + beta

    def to_heads(t):          # (L, C) -> (H, L, Dh); static lane slices + stack
        return jnp.stack(
            [t[:, h * head_dim:(h + 1) * head_dim] for h in range(num_heads)],
            axis=0)

    # --- K/V cache: LN(x2), K, V and their head split run once per batch row
    # (first L1 tile only); every later query tile of this row reuses the
    # head-major bf16 VMEM scratch. Requires the L1-tile axis to be
    # "arbitrary" (sequential per core), which it is.
    @pl.when(pl.program_id(1) == 0)
    def _():
        x2n = layer_norm(x2_ref[0].astype(jnp.float32)).astype(jnp.bfloat16)
        k = (jnp.dot(x2n, wk_ref[...], preferred_element_type=jnp.float32)
             + bk_ref[...]).astype(jnp.bfloat16)                   # (L2, C)
        v = (jnp.dot(x2n, wv_ref[...], preferred_element_type=jnp.float32)
             + bv_ref[...]).astype(jnp.bfloat16)                   # (L2, C)
        kh_ref[...] = to_heads(k)                                  # (H, L2, Dh)
        vh_ref[...] = to_heads(v)                                  # (H, L2, Dh)

    # --- Query side (per L1 tile). Note: when L1 % TL1 != 0 the padded tail
    # rows flow through LN / softmax (possibly inf/NaN), but every op below is
    # row-wise in q and the out-of-bounds part of the output block is never
    # written back, so valid rows are unaffected.
    x1 = x1_ref[0]                                                 # (TL1, C) f32
    x1n = layer_norm(x1).astype(jnp.bfloat16)
    scale = head_dim ** -0.5
    # Scale folded into q: touches a tensor L2/Dh times smaller than s.
    q = ((jnp.dot(x1n, wq_ref[...], preferred_element_type=jnp.float32)
          + bq_ref[...]) * scale).astype(jnp.bfloat16)             # (TL1, C)
    qh = to_heads(q)                                               # (H, TL1, Dh)
    kh = kh_ref[...]
    vh = vh_ref[...]

    # --- Per-head attention: batched (leading-H) MXU contractions, f32 softmax.
    s = jnp.einsum('hqd,hkd->hqk', qh, kh,
                   preferred_element_type=jnp.float32)             # (H, TL1, L2)
    m = jnp.max(s, axis=-1, keepdims=True)
    p = jnp.exp(s - m)
    denom = jnp.sum(p, axis=-1, keepdims=True)
    attn = (p * pl.reciprocal(denom, approx=True)).astype(jnp.bfloat16)
    av = jnp.einsum('hqk,hkd->hqd', attn, vh,
                    preferred_element_type=jnp.float32).astype(jnp.bfloat16)

    # --- Head merge fused into the output projection (no concat relayout):
    # proj[q, c] = sum_h sum_d av[h, q, d] * Wp^T[h*Dh + d, c]
    partial = jnp.einsum('hqd,hdc->hqc', av, wp_ref[...],
                         preferred_element_type=jnp.float32)       # (H, TL1, C)
    proj = jnp.sum(partial, axis=0) + bp_ref[...]                  # (TL1, C) f32
    o_ref[0] = (x1 + proj).astype(o_ref.dtype)


def attention_block2(x1, x2, params, num_heads, *, l1_tile=256):
    B, L1, C = x1.shape
    _, L2, _ = x2.shape
    assert C % num_heads == 0
    head_dim = C // num_heads

    # Query-side sequence tiling; L1 <= l1_tile -> one full block.
    TL1 = L1 if L1 <= l1_tile else l1_tile
    num_l1 = pl.cdiv(L1, TL1)
    grid = (B, num_l1)   # B "parallel" (megacore), L1 tiles "arbitrary" (K/V cache)

    kernel = functools.partial(attention_block2_kernel,
                               num_heads=num_heads, head_dim=head_dim, eps=1e-5)

    # bf16 MXU operands: weights, and x2 (largest streamed input at long L2).
    # Biases / LN params / x1 stay f32 (post-accumulation adds, residual).
    bf16 = jnp.bfloat16
    wq = params["wq_t"].astype(bf16)
    wk = params["wk_t"].astype(bf16)
    wv = params["wv_t"].astype(bf16)
    # Output projection weight pre-split per head: (C_in, C_out) -> (H, Dh, C)
    # so the kernel can fuse the head merge into the projection.
    wp = params["wp_t"].astype(bf16).reshape(num_heads, head_dim, C)
    x2_bf16 = x2.astype(bf16)

    def const_spec(shape):    # grid-invariant operands (weights, biases, LN params)
        return pl.BlockSpec(shape, lambda b, l: (0,) * len(shape))

    in_specs = [
        pl.BlockSpec((1, TL1, C), lambda b, l: (b, l, 0)),   # x1 (queries, f32)
        pl.BlockSpec((1, L2, C), lambda b, l: (b, 0, 0)),    # x2 (keys/values, bf16)
        const_spec((1, C)), const_spec((1, C)),              # gamma, beta
        const_spec((C, C)), const_spec((1, C)),              # Wq^T (bf16), bq
        const_spec((C, C)), const_spec((1, C)),              # Wk^T (bf16), bk
        const_spec((C, C)), const_spec((1, C)),              # Wv^T (bf16), bv
        const_spec((num_heads, head_dim, C)), const_spec((1, C)),  # Wp^T heads, bp
    ]
    out_specs = pl.BlockSpec((1, TL1, C), lambda b, l: (b, l, 0))

    # Scoped-VMEM budget from the real per-step footprint (double-buffered
    # weights / streamed tiles, K/V scratch, f32 softmax intermediates).
    est = (2 * 4 * C * C * 2                        # bf16 weights x 2 buffers
           + 2 * 2 * TL1 * C * 4                    # x1 + out tiles x 2 buffers
           + 2 * L2 * C * 2                         # x2 bf16 x 2 buffers
           + 2 * L2 * C * 2                         # K/V head scratch
           + 3 * num_heads * TL1 * L2 * 4           # s / p / attn
           + num_heads * TL1 * C * 4                # per-head partial projection
           + 6 * max(TL1, L2) * C * 4               # q/k/v/x1n/x2n temporaries
           + (2 << 20))                             # slack
    vmem_limit = int(min(max(est, 32 << 20), 64 << 20))

    return pl.pallas_call(
        kernel,
        out_shape=jax.ShapeDtypeStruct((B, L1, C), jnp.float32),
        grid_spec=pltpu.PrefetchScalarGridSpec(
            num_scalar_prefetch=0,
            grid=grid,
            in_specs=in_specs,
            out_specs=out_specs,
            scratch_shapes=[
                pltpu.VMEM((num_heads, L2, head_dim), bf16),  # cached K heads
                pltpu.VMEM((num_heads, L2, head_dim), bf16),  # cached V heads
            ]),
        compiler_params=pltpu.CompilerParams(
            dimension_semantics=("parallel", "arbitrary"),
            vmem_limit_bytes=vmem_limit),
    )(x1, x2_bf16,
      params["gamma"], params["beta"],
      wq, params["bq"],
      wk, params["bk"],
      wv, params["bv"],
      wp, params["bp"])


def reference_forward(x1, x2, params, num_heads):
    """Pure-JAX f32 replica of the PyTorch forward (eval mode, flash path)."""
    B, L1, C = x1.shape
    L2 = x2.shape[1]
    Dh = C // num_heads
    eps = 1e-5

    def ln(x):
        mu = jnp.mean(x, axis=-1, keepdims=True)
        var = jnp.mean(jnp.square(x - mu), axis=-1, keepdims=True)
        return (x - mu) / jnp.sqrt(var + eps) * params["gamma"] + params["beta"]

    x1n, x2n = ln(x1), ln(x2)
    q = x1n @ params["wq_t"] + params["bq"]
    k = x2n @ params["wk_t"] + params["bk"]
    v = x2n @ params["wv_t"] + params["bv"]

    def split(t, L):
        return t.reshape(B, L, num_heads, Dh).transpose(0, 2, 1, 3)

    qh, kh, vh = split(q, L1), split(k, L2), split(v, L2)
    s = jnp.einsum("bhqd,bhkd->bhqk", qh, kh) * (Dh ** -0.5)
    attn = jax.nn.softmax(s, axis=-1)
    o = jnp.einsum("bhqk,bhkd->bhqd", attn, vh)
    o = o.transpose(0, 2, 1, 3).reshape(B, L1, C)
    h = o @ params["wp_t"] + params["bp"]
    return x1 + h


def make_params(key, C):
    ks = jax.random.split(key, 10)
    bound = 1.0 / np.sqrt(C)

    def lin(kw, kb):
        w = jax.random.uniform(kw, (C, C), jnp.float32, -bound, bound)  # (out, in) like torch
        b = jax.random.uniform(kb, (1, C), jnp.float32, -bound, bound)
        return w.T, b  # pass W^T so kernels do x @ W^T + b

    wq_t, bq = lin(ks[0], ks[1])
    wk_t, bk = lin(ks[2], ks[3])
    wv_t, bv = lin(ks[4], ks[5])
    wp_t, bp = lin(ks[6], ks[7])
    gamma = 1.0 + 0.1 * jax.random.normal(ks[8], (1, C), jnp.float32)
    beta = 0.1 * jax.random.normal(ks[9], (1, C), jnp.float32)
    return dict(gamma=gamma, beta=beta,
                wq_t=wq_t, bq=bq, wk_t=wk_t, bk=bk,
                wv_t=wv_t, bv=bv, wp_t=wp_t, bp=bp)


if __name__ == "__main__":
    # Small but lane-dense shapes: C multiple of 128 so stores are unmasked;
    # B=2 gives two "parallel" grid steps (keeps both v7x TensorCores busy).
    B, L1, L2, C, H = 2, 16, 32, 128, 4

    key = jax.random.PRNGKey(0)
    k_x1, k_x2, k_p = jax.random.split(key, 3)
    x1 = jax.random.normal(k_x1, (B, L1, C), jnp.float32)
    x2 = jax.random.normal(k_x2, (B, L2, C), jnp.float32)
    params = make_params(k_p, C)

    out = attention_block2(x1, x2, params, num_heads=H)
    out = jax.block_until_ready(out)

    ref = reference_forward(x1, x2, params, num_heads=H)
    # bf16 MXU operands (weights, x2, activations) => loosened tolerance vs f32 ref.
    np.testing.assert_allclose(np.asarray(out), np.asarray(ref), rtol=5e-2, atol=5e-2)

    print("KERNEL_OK")
</pallas_src>

<mosaic_0001>
module attributes {stable_mosaic.version = 11 : i64} {
  func.func @attention_block2_kernel(%arg0: i32, %arg1: i32, %arg2: memref<1x16x128xf32, #tpu.memory_space<vmem>>, %arg3: memref<1x32x128xbf16, #tpu.memory_space<vmem>>, %arg4: memref<1x128xf32, #tpu.memory_space<vmem>>, %arg5: memref<1x128xf32, #tpu.memory_space<vmem>>, %arg6: memref<128x128xbf16, #tpu.memory_space<vmem>>, %arg7: memref<1x128xf32, #tpu.memory_space<vmem>>, %arg8: memref<128x128xbf16, #tpu.memory_space<vmem>>, %arg9: memref<1x128xf32, #tpu.memory_space<vmem>>, %arg10: memref<128x128xbf16, #tpu.memory_space<vmem>>, %arg11: memref<1x128xf32, #tpu.memory_space<vmem>>, %arg12: memref<4x32x128xbf16, #tpu.memory_space<vmem>>, %arg13: memref<1x128xf32, #tpu.memory_space<vmem>>, %arg14: memref<1x16x128xf32, #tpu.memory_space<vmem>>, %arg15: memref<4x32x32xbf16, #tpu.memory_space<vmem>>, %arg16: memref<4x32x32xbf16, #tpu.memory_space<vmem>>) attributes {dimension_semantics = [#tpu.dimension_semantics<parallel>, #tpu.dimension_semantics<arbitrary>], iteration_bounds = array<i64: 2, 1>, scalar_prefetch = 0 : i64, scratch_operands = 2 : i64, tpu.core_type = #tpu.core_type<tc>, window_params = [{transform_indices = @transform_0, window_bounds = array<i64: 1, 16, 128>}, {transform_indices = @transform_1, window_bounds = array<i64: 1, 32, 128>}, {pipeline_mode = #tpu.pipeline_mode<synchronous>, transform_indices = @transform_2, window_bounds = array<i64: 1, 128>}, {pipeline_mode = #tpu.pipeline_mode<synchronous>, transform_indices = @transform_3, window_bounds = array<i64: 1, 128>}, {pipeline_mode = #tpu.pipeline_mode<synchronous>, transform_indices = @transform_4, window_bounds = array<i64: 128, 128>}, {pipeline_mode = #tpu.pipeline_mode<synchronous>, transform_indices = @transform_5, window_bounds = array<i64: 1, 128>}, {pipeline_mode = #tpu.pipeline_mode<synchronous>, transform_indices = @transform_6, window_bounds = array<i64: 128, 128>}, {pipeline_mode = #tpu.pipeline_mode<synchronous>, transform_indices = @transform_7, window_bounds = array<i64: 1, 128>}, {pipeline_mode = #tpu.pipeline_mode<synchronous>, transform_indices = @transform_8, window_bounds = array<i64: 128, 128>}, {pipeline_mode = #tpu.pipeline_mode<synchronous>, transform_indices = @transform_9, window_bounds = array<i64: 1, 128>}, {pipeline_mode = #tpu.pipeline_mode<synchronous>, transform_indices = @transform_10, window_bounds = array<i64: 4, 32, 128>}, {pipeline_mode = #tpu.pipeline_mode<synchronous>, transform_indices = @transform_11, window_bounds = array<i64: 1, 128>}, {transform_indices = @transform_12, window_bounds = array<i64: 1, 16, 128>}]} {
    %c0 = arith.constant 0 : index
    %c0_0 = arith.constant 0 : index
    %0 = vector.load %arg4[%c0, %c0_0] : memref<1x128xf32, #tpu.memory_space<vmem>>, vector<1x128xf32>
    %c0_1 = arith.constant 0 : index
    %c0_2 = arith.constant 0 : index
    %1 = vector.load %arg5[%c0_1, %c0_2] : memref<1x128xf32, #tpu.memory_space<vmem>>, vector<1x128xf32>
    %c0_i32 = arith.constant 0 : i32
    %2 = arith.cmpi eq, %arg1, %c0_i32 : i32
    %3 = arith.extui %2 : i1 to i32
    %c0_i32_3 = arith.constant 0 : i32
    %4 = arith.cmpi ne, %3, %c0_i32_3 : i32
    scf.if %4 {
      %c0_37 = arith.constant 0 : index
      %c0_38 = arith.constant 0 : index
      %c0_39 = arith.constant 0 : index
      %73 = vector.load %arg3[%c0_37, %c0_38, %c0_39] : memref<1x32x128xbf16, #tpu.memory_space<vmem>>, vector<1x32x128xbf16>
      %74 = vector.shape_cast %73 : vector<1x32x128xbf16> to vector<32x128xbf16>
      %75 = arith.extf %74 : vector<32x128xbf16> to vector<32x128xf32>
      %cst_40 = arith.constant dense<0.000000e+00> : vector<32xf32>
      %76 = vector.multi_reduction <add>, %75, %cst_40 [1] : vector<32x128xf32> to vector<32xf32>
      %77 = vector.shape_cast %76 : vector<32xf32> to vector<32x1xf32>
      %cst_41 = arith.constant 1.280000e+02 : f32
      %78 = vector.broadcast %cst_41 : f32 to vector<32x1xf32>
      %79 = arith.divf %77, %78 : vector<32x1xf32>
      %80 = vector.broadcast %79 : vector<32x1xf32> to vector<32x128xf32>
      %81 = arith.subf %75, %80 : vector<32x128xf32>
      %82 = arith.mulf %81, %81 : vector<32x128xf32>
      %cst_42 = arith.constant dense<0.000000e+00> : vector<32xf32>
      %83 = vector.multi_reduction <add>, %82, %cst_42 [1] : vector<32x128xf32> to vector<32xf32>
      %84 = vector.shape_cast %83 : vector<32xf32> to vector<32x1xf32>
      %cst_43 = arith.constant 1.280000e+02 : f32
      %85 = vector.broadcast %cst_43 : f32 to vector<32x1xf32>
      %86 = arith.divf %84, %85 : vector<32x1xf32>
      %87 = vector.broadcast %79 : vector<32x1xf32> to vector<32x128xf32>
      %88 = arith.subf %75, %87 : vector<32x128xf32>
      %cst_44 = arith.constant 9.99999974E-6 : f32
      %89 = vector.broadcast %cst_44 : f32 to vector<32x1xf32>
      %90 = arith.addf %86, %89 : vector<32x1xf32>
      %91 = math.rsqrt %90 : vector<32x1xf32>
      %92 = vector.broadcast %91 : vector<32x1xf32> to vector<32x128xf32>
      %93 = arith.mulf %88, %92 : vector<32x128xf32>
      %94 = vector.broadcast %0 : vector<1x128xf32> to vector<32x128xf32>
      %95 = arith.mulf %93, %94 : vector<32x128xf32>
      %96 = vector.broadcast %1 : vector<1x128xf32> to vector<32x128xf32>
      %97 = arith.addf %95, %96 : vector<32x128xf32>
      %98 = arith.truncf %97 : vector<32x128xf32> to vector<32x128xbf16>
      %c0_45 = arith.constant 0 : index
      %c0_46 = arith.constant 0 : index
      %99 = vector.load %arg8[%c0_45, %c0_46] : memref<128x128xbf16, #tpu.memory_space<vmem>>, vector<128x128xbf16>
      %cst_47 = arith.constant dense<0.000000e+00> : vector<32x128xf32>
      %100 = tpu.matmul %98, %99, %cst_47 {dimension_numbers = #tpu.dot_dimension_numbers<[1], [0], [0], [1], [0, 0, 1, 1], [], []>} : vector<32x128xbf16>, vector<128x128xbf16>, vector<32x128xf32> -> vector<32x128xf32>
      %c0_48 = arith.constant 0 : index
      %c0_49 = arith.constant 0 : index
      %101 = vector.load %arg9[%c0_48, %c0_49] : memref<1x128xf32, #tpu.memory_space<vmem>>, vector<1x128xf32>
      %102 = vector.broadcast %101 : vector<1x128xf32> to vector<32x128xf32>
      %103 = arith.addf %100, %102 : vector<32x128xf32>
      %104 = arith.truncf %103 : vector<32x128xf32> to vector<32x128xbf16>
      %c0_50 = arith.constant 0 : index
      %c0_51 = arith.constant 0 : index
      %105 = vector.load %arg10[%c0_50, %c0_51] : memref<128x128xbf16, #tpu.memory_space<vmem>>, vector<128x128xbf16>
      %cst_52 = arith.constant dense<0.000000e+00> : vector<32x128xf32>
      %106 = tpu.matmul %98, %105, %cst_52 {dimension_numbers = #tpu.dot_dimension_numbers<[1], [0], [0], [1], [0, 0, 1, 1], [], []>} : vector<32x128xbf16>, vector<128x128xbf16>, vector<32x128xf32> -> vector<32x128xf32>
      %c0_53 = arith.constant 0 : index
      %c0_54 = arith.constant 0 : index
      %107 = vector.load %arg11[%c0_53, %c0_54] : memref<1x128xf32, #tpu.memory_space<vmem>>, vector<1x128xf32>
      %108 = vector.broadcast %107 : vector<1x128xf32> to vector<32x128xf32>
      %109 = arith.addf %106, %108 : vector<32x128xf32>
      %110 = arith.truncf %109 : vector<32x128xf32> to vector<32x128xbf16>
      %111 = vector.extract_strided_slice %104 {offsets = [0, 0], sizes = [32, 32], strides = [1, 1]} : vector<32x128xbf16> to vector<32x32xbf16>
      %112 = vector.extract_strided_slice %104 {offsets = [0, 32], sizes = [32, 32], strides = [1, 1]} : vector<32x128xbf16> to vector<32x32xbf16>
      %113 = vector.extract_strided_slice %104 {offsets = [0, 64], sizes = [32, 32], strides = [1, 1]} : vector<32x128xbf16> to vector<32x32xbf16>
      %114 = vector.extract_strided_slice %104 {offsets = [0, 96], sizes = [32, 32], strides = [1, 1]} : vector<32x128xbf16> to vector<32x32xbf16>
      %115 = vector.shape_cast %111 : vector<32x32xbf16> to vector<1x32x32xbf16>
      %116 = vector.shape_cast %112 : vector<32x32xbf16> to vector<1x32x32xbf16>
      %117 = vector.shape_cast %113 : vector<32x32xbf16> to vector<1x32x32xbf16>
      %118 = vector.shape_cast %114 : vector<32x32xbf16> to vector<1x32x32xbf16>
      %119 = tpu.concatenate %115, %116, %117, %118 in 0 : vector<1x32x32xbf16>, vector<1x32x32xbf16>, vector<1x32x32xbf16>, vector<1x32x32xbf16> -> vector<4x32x32xbf16>
      %c0_55 = arith.constant 0 : index
      %c0_56 = arith.constant 0 : index
      %c0_57 = arith.constant 0 : index
      %120 = vector.load %arg15[%c0_55, %c0_56, %c0_57] : memref<4x32x32xbf16, #tpu.memory_space<vmem>>, vector<4x32x32xbf16>
      tpu.vector_store %arg15[%c0_55, %c0_56, %c0_57], %119 {strides = array<i32>} : memref<4x32x32xbf16, #tpu.memory_space<vmem>>, vector<4x32x32xbf16>,
      %121 = vector.extract_strided_slice %110 {offsets = [0, 0], sizes = [32, 32], strides = [1, 1]} : vector<32x128xbf16> to vector<32x32xbf16>
      %122 = vector.extract_strided_slice %110 {offsets = [0, 32], sizes = [32, 32], strides = [1, 1]} : vector<32x128xbf16> to vector<32x32xbf16>
      %123 = vector.extract_strided_slice %110 {offsets = [0, 64], sizes = [32, 32], strides = [1, 1]} : vector<32x128xbf16> to vector<32x32xbf16>
      %124 = vector.extract_strided_slice %110 {offsets = [0, 96], sizes = [32, 32], strides = [1, 1]} : vector<32x128xbf16> to vector<32x32xbf16>
      %125 = vector.shape_cast %121 : vector<32x32xbf16> to vector<1x32x32xbf16>
      %126 = vector.shape_cast %122 : vector<32x32xbf16> to vector<1x32x32xbf16>
      %127 = vector.shape_cast %123 : vector<32x32xbf16> to vector<1x32x32xbf16>
      %128 = vector.shape_cast %124 : vector<32x32xbf16> to vector<1x32x32xbf16>
      %129 = tpu.concatenate %125, %126, %127, %128 in 0 : vector<1x32x32xbf16>, vector<1x32x32xbf16>, vector<1x32x32xbf16>, vector<1x32x32xbf16> -> vector<4x32x32xbf16>
      %c0_58 = arith.constant 0 : index
      %c0_59 = arith.constant 0 : index
      %c0_60 = arith.constant 0 : index
      %130 = vector.load %arg16[%c0_58, %c0_59, %c0_60] : memref<4x32x32xbf16, #tpu.memory_space<vmem>>, vector<4x32x32xbf16>
      tpu.vector_store %arg16[%c0_58, %c0_59, %c0_60], %129 {strides = array<i32>} : memref<4x32x32xbf16, #tpu.memory_space<vmem>>, vector<4x32x32xbf16>,
    } else {
    }
    %c0_4 = arith.constant 0 : index
    %c0_5 = arith.constant 0 : index
    %c0_6 = arith.constant 0 : index
    %5 = vector.load %arg2[%c0_4, %c0_5, %c0_6] : memref<1x16x128xf32, #tpu.memory_space<vmem>>, vector<1x16x128xf32>
    %6 = vector.shape_cast %5 : vector<1x16x128xf32> to vector<16x128xf32>
    %cst = arith.constant dense<0.000000e+00> : vector<16xf32>
    %7 = vector.multi_reduction <add>, %6, %cst [1] : vector<16x128xf32> to vector<16xf32>
    %8 = vector.shape_cast %7 : vector<16xf32> to vector<16x1xf32>
    %cst_7 = arith.constant 1.280000e+02 : f32
    %9 = vector.broadcast %cst_7 : f32 to vector<16x1xf32>
    %10 = arith.divf %8, %9 : vector<16x1xf32>
    %11 = vector.broadcast %10 : vector<16x1xf32> to vector<16x128xf32>
    %12 = arith.subf %6, %11 : vector<16x128xf32>
    %13 = arith.mulf %12, %12 : vector<16x128xf32>
    %cst_8 = arith.constant dense<0.000000e+00> : vector<16xf32>
    %14 = vector.multi_reduction <add>, %13, %cst_8 [1] : vector<16x128xf32> to vector<16xf32>
    %15 = vector.shape_cast %14 : vector<16xf32> to vector<16x1xf32>
    %cst_9 = arith.constant 1.280000e+02 : f32
    %16 = vector.broadcast %cst_9 : f32 to vector<16x1xf32>
    %17 = arith.divf %15, %16 : vector<16x1xf32>
    %18 = vector.broadcast %10 : vector<16x1xf32> to vector<16x128xf32>
    %19 = arith.subf %6, %18 : vector<16x128xf32>
    %cst_10 = arith.constant 9.99999974E-6 : f32
    %20 = vector.broadcast %cst_10 : f32 to vector<16x1xf32>
    %21 = arith.addf %17, %20 : vector<16x1xf32>
    %22 = math.rsqrt %21 : vector<16x1xf32>
    %23 = vector.broadcast %22 : vector<16x1xf32> to vector<16x128xf32>
    %24 = arith.mulf %19, %23 : vector<16x128xf32>
    %25 = vector.broadcast %0 : vector<1x128xf32> to vector<16x128xf32>
    %26 = arith.mulf %24, %25 : vector<16x128xf32>
    %27 = vector.broadcast %1 : vector<1x128xf32> to vector<16x128xf32>
    %28 = arith.addf %26, %27 : vector<16x128xf32>
    %29 = arith.truncf %28 : vector<16x128xf32> to vector<16x128xbf16>
    %c0_11 = arith.constant 0 : index
    %c0_12 = arith.constant 0 : index
    %30 = vector.load %arg6[%c0_11, %c0_12] : memref<128x128xbf16, #tpu.memory_space<vmem>>, vector<128x128xbf16>
    %cst_13 = arith.constant dense<0.000000e+00> : vector<16x128xf32>
    %31 = tpu.matmul %29, %30, %cst_13 {dimension_numbers = #tpu.dot_dimension_numbers<[1], [0], [0], [1], [0, 0, 1, 1], [], []>} : vector<16x128xbf16>, vector<128x128xbf16>, vector<16x128xf32> -> vector<16x128xf32>
    %c0_14 = arith.constant 0 : index
    %c0_15 = arith.constant 0 : index
    %32 = vector.load %arg7[%c0_14, %c0_15] : memref<1x128xf32, #tpu.memory_space<vmem>>, vector<1x128xf32>
    %33 = vector.broadcast %32 : vector<1x128xf32> to vector<16x128xf32>
    %34 = arith.addf %31, %33 : vector<16x128xf32>
    %cst_16 = arith.constant 0.176776692 : f32
    %35 = vector.broadcast %cst_16 : f32 to vector<16x128xf32>
    %36 = arith.mulf %34, %35 : vector<16x128xf32>
    %37 = arith.truncf %36 : vector<16x128xf32> to vector<16x128xbf16>
    %38 = vector.extract_strided_slice %37 {offsets = [0, 0], sizes = [16, 32], strides = [1, 1]} : vector<16x128xbf16> to vector<16x32xbf16>
    %39 = vector.extract_strided_slice %37 {offsets = [0, 32], sizes = [16, 32], strides = [1, 1]} : vector<16x128xbf16> to vector<16x32xbf16>
    %40 = vector.extract_strided_slice %37 {offsets = [0, 64], sizes = [16, 32], strides = [1, 1]} : vector<16x128xbf16> to vector<16x32xbf16>
    %41 = vector.extract_strided_slice %37 {offsets = [0, 96], sizes = [16, 32], strides = [1, 1]} : vector<16x128xbf16> to vector<16x32xbf16>
    %42 = vector.shape_cast %38 : vector<16x32xbf16> to vector<1x16x32xbf16>
    %43 = vector.shape_cast %39 : vector<16x32xbf16> to vector<1x16x32xbf16>
    %44 = vector.shape_cast %40 : vector<16x32xbf16> to vector<1x16x32xbf16>
    %45 = vector.shape_cast %41 : vector<16x32xbf16> to vector<1x16x32xbf16>
    %46 = tpu.concatenate %42, %43, %44, %45 in 0 : vector<1x16x32xbf16>, vector<1x16x32xbf16>, vector<1x16x32xbf16>, vector<1x16x32xbf16> -> vector<4x16x32xbf16>
    %c0_17 = arith.constant 0 : index
    %c0_18 = arith.constant 0 : index
    %c0_19 = arith.constant 0 : index
    %47 = vector.load %arg15[%c0_17, %c0_18, %c0_19] : memref<4x32x32xbf16, #tpu.memory_space<vmem>>, vector<4x32x32xbf16>
    %c0_20 = arith.constant 0 : index
    %c0_21 = arith.constant 0 : index
    %c0_22 = arith.constant 0 : index
    %48 = vector.load %arg16[%c0_20, %c0_21, %c0_22] : memref<4x32x32xbf16, #tpu.memory_space<vmem>>, vector<4x32x32xbf16>
    "tpu.trace_start"() <{level = 10 : i32, message = "hqd,hkd->hqk"}> : () -> ()
    %cst_23 = arith.constant dense<0.000000e+00> : vector<4x16x32xf32>
    %49 = tpu.matmul %46, %47, %cst_23 {dimension_numbers = #tpu.dot_dimension_numbers<[2], [2], [1], [1], [0, 0, 0, 1, 1, 1], [0], [0]>} : vector<4x16x32xbf16>, vector<4x32x32xbf16>, vector<4x16x32xf32> -> vector<4x16x32xf32>
    "tpu.trace_stop"() : () -> ()
    %cst_24 = arith.constant dense<0xFF800000> : vector<4x16xf32>
    %50 = vector.multi_reduction <maximumf>, %49, %cst_24 [2] : vector<4x16x32xf32> to vector<4x16xf32>
    %51 = vector.shape_cast %50 : vector<4x16xf32> to vector<4x16x1xf32>
    %52 = vector.broadcast %51 : vector<4x16x1xf32> to vector<4x16x32xf32>
    %53 = arith.subf %49, %52 : vector<4x16x32xf32>
    %54 = math.exp %53 : vector<4x16x32xf32>
    %cst_25 = arith.constant dense<0.000000e+00> : vector<4x16xf32>
    %55 = vector.multi_reduction <add>, %54, %cst_25 [2] : vector<4x16x32xf32> to vector<4x16xf32>
    %56 = vector.shape_cast %55 : vector<4x16xf32> to vector<4x16x1xf32>
    %57 = tpu.reciprocal %56 {approx = true} : vector<4x16x1xf32> -> vector<4x16x1xf32>
    %58 = vector.broadcast %57 : vector<4x16x1xf32> to vector<4x16x32xf32>
    %59 = arith.mulf %54, %58 : vector<4x16x32xf32>
    %60 = arith.truncf %59 : vector<4x16x32xf32> to vector<4x16x32xbf16>
    "tpu.trace_start"() <{level = 10 : i32, message = "hqk,hkd->hqd"}> : () -> ()
    %cst_26 = arith.constant dense<0.000000e+00> : vector<4x16x32xf32>
    %61 = tpu.matmul %60, %48, %cst_26 {dimension_numbers = #tpu.dot_dimension_numbers<[2], [1], [1], [2], [0, 0, 0, 1, 1, 2], [0], [0]>} : vector<4x16x32xbf16>, vector<4x32x32xbf16>, vector<4x16x32xf32> -> vector<4x16x32xf32>
    "tpu.trace_stop"() : () -> ()
    %62 = arith.truncf %61 : vector<4x16x32xf32> to vector<4x16x32xbf16>
    %c0_27 = arith.constant 0 : index
    %c0_28 = arith.constant 0 : index
    %c0_29 = arith.constant 0 : index
    %63 = vector.load %arg12[%c0_27, %c0_28, %c0_29] : memref<4x32x128xbf16, #tpu.memory_space<vmem>>, vector<4x32x128xbf16>
    "tpu.trace_start"() <{level = 10 : i32, message = "hqd,hdc->hqc"}> : () -> ()
    %cst_30 = arith.constant dense<0.000000e+00> : vector<4x16x128xf32>
    %64 = tpu.matmul %62, %63, %cst_30 {dimension_numbers = #tpu.dot_dimension_numbers<[2], [1], [1], [2], [0, 0, 0, 1, 1, 2], [0], [0]>} : vector<4x16x32xbf16>, vector<4x32x128xbf16>, vector<4x16x128xf32> -> vector<4x16x128xf32>
    "tpu.trace_stop"() : () -> ()
    %cst_31 = arith.constant dense<0.000000e+00> : vector<16x128xf32>
    %65 = vector.multi_reduction <add>, %64, %cst_31 [0] : vector<4x16x128xf32> to vector<16x128xf32>
    %c0_32 = arith.constant 0 : index
    %c0_33 = arith.constant 0 : index
    %66 = vector.load %arg13[%c0_32, %c0_33] : memref<1x128xf32, #tpu.memory_space<vmem>>, vector<1x128xf32>
    %67 = vector.broadcast %66 : vector<1x128xf32> to vector<16x128xf32>
    %68 = arith.addf %65, %67 : vector<16x128xf32>
    %69 = arith.addf %6, %68 : vector<16x128xf32>
    %c0_34 = arith.constant 0 : index
    %c0_35 = arith.constant 0 : index
    %c0_36 = arith.constant 0 : index
    %70 = vector.load %arg14[%c0_34, %c0_35, %c0_36] : memref<1x16x128xf32, #tpu.memory_space<vmem>>, vector<1x16x128xf32>
    %71 = vector.shape_cast %70 : vector<1x16x128xf32> to vector<16x128xf32>
    %72 = vector.shape_cast %69 : vector<16x128xf32> to vector<1x16x128xf32>
    tpu.vector_store %arg14[%c0_34, %c0_35, %c0_36], %72 {strides = array<i32>} : memref<1x16x128xf32, #tpu.memory_space<vmem>>, vector<1x16x128xf32>,
    return
  }
  func.func @transform_0(%arg0: i32, %arg1: i32) -> (i32, i32, i32) {
    %c0_i32 = arith.constant 0 : i32
    %c0_i32_0 = arith.constant 0 : i32
    return %arg0, %arg1, %c0_i32 : i32, i32, i32
  }
  func.func @transform_1(%arg0: i32, %arg1: i32) -> (i32, i32, i32) {
    %c0_i32 = arith.constant 0 : i32
    %c0_i32_0 = arith.constant 0 : i32
    %c0_i32_1 = arith.constant 0 : i32
    return %arg0, %c0_i32, %c0_i32_0 : i32, i32, i32
  }
  func.func @transform_2(%arg0: i32, %arg1: i32) -> (i32, i32) {
    %c0_i32 = arith.constant 0 : i32
    %c0_i32_0 = arith.constant 0 : i32
    %c0_i32_1 = arith.constant 0 : i32
    return %c0_i32, %c0_i32_0 : i32, i32
  }
  func.func @transform_3(%arg0: i32, %arg1: i32) -> (i32, i32) {
    %c0_i32 = arith.constant 0 : i32
    %c0_i32_0 = arith.constant 0 : i32
    %c0_i32_1 = arith.constant 0 : i32
    return %c0_i32, %c0_i32_0 : i32, i32
  }
  func.func @transform_4(%arg0: i32, %arg1: i32) -> (i32, i32) {
    %c0_i32 = arith.constant 0 : i32
    %c0_i32_0 = arith.constant 0 : i32
    %c0_i32_1 = arith.constant 0 : i32
    return %c0_i32, %c0_i32_0 : i32, i32
  }
  func.func @transform_5(%arg0: i32, %arg1: i32) -> (i32, i32) {
    %c0_i32 = arith.constant 0 : i32
    %c0_i32_0 = arith.constant 0 : i32
    %c0_i32_1 = arith.constant 0 : i32
    return %c0_i32, %c0_i32_0 : i32, i32
  }
  func.func @transform_6(%arg0: i32, %arg1: i32) -> (i32, i32) {
    %c0_i32 = arith.constant 0 : i32
    %c0_i32_0 = arith.constant 0 : i32
    %c0_i32_1 = arith.constant 0 : i32
    return %c0_i32, %c0_i32_0 : i32, i32
  }
  func.func @transform_7(%arg0: i32, %arg1: i32) -> (i32, i32) {
    %c0_i32 = arith.constant 0 : i32
    %c0_i32_0 = arith.constant 0 : i32
    %c0_i32_1 = arith.constant 0 : i32
    return %c0_i32, %c0_i32_0 : i32, i32
  }
  func.func @transform_8(%arg0: i32, %arg1: i32) -> (i32, i32) {
    %c0_i32 = arith.constant 0 : i32
    %c0_i32_0 = arith.constant 0 : i32
    %c0_i32_1 = arith.constant 0 : i32
    return %c0_i32, %c0_i32_0 : i32, i32
  }
  func.func @transform_9(%arg0: i32, %arg1: i32) -> (i32, i32) {
    %c0_i32 = arith.constant 0 : i32
    %c0_i32_0 = arith.constant 0 : i32
    %c0_i32_1 = arith.constant 0 : i32
    return %c0_i32, %c0_i32_0 : i32, i32
  }
  func.func @transform_10(%arg0: i32, %arg1: i32) -> (i32, i32, i32) {
    %c0_i32 = arith.constant 0 : i32
    %c0_i32_0 = arith.constant 0 : i32
    %c0_i32_1 = arith.constant 0 : i32
    %c0_i32_2 = arith.constant 0 : i32
    return %c0_i32, %c0_i32_0, %c0_i32_1 : i32, i32, i32
  }
  func.func @transform_11(%arg0: i32, %arg1: i32) -> (i32, i32) {
    %c0_i32 = arith.constant 0 : i32
    %c0_i32_0 = arith.constant 0 : i32
    %c0_i32_1 = arith.constant 0 : i32
    return %c0_i32, %c0_i32_0 : i32, i32
  }
  func.func @transform_12(%arg0: i32, %arg1: i32) -> (i32, i32, i32) {
    %c0_i32 = arith.constant 0 : i32
    %c0_i32_0 = arith.constant 0 : i32
    return %arg0, %arg1, %c0_i32 : i32, i32, i32
  }
}

</mosaic_0001>

<bundles_post_ra>
// kernel: tpu_custom_call.1
= control target key start
LH: loop header
LB: loop body
LE: loop exit
PB: predicated region body
PF: predicated region fallthrough
CT: control target
= control target key end

     0   :  { %s3623_s0 = inlined_call_operand.hbm [shape: f32[2,16,128], index: 0, kind: input, shape index: {}]   ;;  %s3624_s1 = inlined_call_operand.hbm [shape: bf16[2,32,128], index: 1, kind: input, shape index: {}]   ;;  %s3625_s2 = inlined_call_operand.vmem [shape: f32[1,128], index: 2, kind: input, shape index: {}]   ;;  %s3626_s3 = inlined_call_operand.vmem [shape: f32[1,128], index: 3, kind: input, shape index: {}]   ;;  %s3627_s4 = inlined_call_operand.hbm [shape: bf16[128,128], index: 4, kind: input, shape index: {}]   ;;  %s3628_s5 = inlined_call_operand.vmem [shape: f32[1,128], index: 5, kind: input, shape index: {}]   ;;  %s3629_s6 = inlined_call_operand.hbm [shape: bf16[128,128], index: 6, kind: input, shape index: {}]   ;;  %s3630_s7 = inlined_call_operand.vmem [shape: f32[1,128], index: 7, kind: input, shape index: {}]   ;;  %s3631_s8 = inlined_call_operand.hbm [shape: bf16[128,128], index: 8, kind: input, shape index: {}]   ;;  %s3632_s9 = inlined_call_operand.vmem [shape: f32[1,128], index: 9, kind: input, shape index: {}]   ;;  %s3633_s10 = inlined_call_operand.hbm [shape: bf16[4,32,128], index: 10, kind: input, shape index: {}]   ;;  %s3634_s11 = inlined_call_operand.vmem [shape: f32[1,128], index: 11, kind: input, shape index: {}]   ;;  %s3635_s12 = inlined_call_operand.hbm [shape: f32[2,16,128], index: 12, kind: output, shape index: {}]  }
   0x1   :  { %3647 = sst [smem:[#allocation28_spill]] %s3623_s0 }
   0x2   :  { %3648 = sst [smem:[#allocation29_spill]] %s3627_s4 }
   0x3   :  { %3649 = sst [smem:[#allocation30_spill]] %s3629_s6 }
   0x4   :  { %3650 = sst [smem:[#allocation31_spill]] %s3631_s8 }
   0x5   :  { %3651 = sst [smem:[#allocation32_spill]] %s3633_s10 }
   0x6   :  { %3652 = sst [smem:[#allocation33_spill]] %s3634_s11 }
   0x7   :  { %3653 = sst [smem:[#allocation34_spill]] %s3635_s12 }
   0x8   :  { %17 = vsyncpa [#allocation5], 0 }
   0x9   :  { %19 = vsyncpa [#allocation5 + $0x1], 0 }
   0xa   :  { %20 = vsyncpa [#allocation8], 0 }
   0xb   :  { %22 = vsyncpa [#allocation8 + $0x1], 0 }
   0xc   :  { %23 = vsyncpa [#allocation11], 0 }
   0xd   :  { %24 = vsyncpa [#allocation14], 0 }
   0xe   :  { %25 = vsyncpa [#allocation6], 0 }
   0xf   :  { %27 = vsyncpa [#allocation6 + $0x1], 0  ;;  %s3133_s21 = smov 0   ;;  %s3135_s22 = smov 0  }
  0x10   :  { %s3137_s23 = smov 0   ;;  %s3139_s24 = smov 0  }
  0x11   :  { %s3141_s25 = smov 0   ;;  %s3143_s26 = smov 0  }
  0x12 LB: > { %3654 = sst [smem:[#allocation22_spill]] %s3028_s21  ;;  %s3164_s27 = sadd.s32 4294967295, %s3048_s26   ;;  %s3048_s26 = sphi %s3143_s26, %s33_s26   ;;  %s3044_s25 = sphi %s3141_s25, %s3692_s25   ;;  %s3040_s24 = sphi %s3139_s24, %s3691_s24   ;;  %s3036_s23 = sphi %s3137_s23, %s3687_s23   ;;  %s3032_s22 = sphi %s3135_s22, %s3690_s22   ;;  %s3028_s21 = sphi %s3133_s21, %s3689_s21  }
  0x13   : > { %3655 = sst [smem:[#allocation23_spill]] %s3036_s23  ;;  %s2214_s28 = sadd.s32 4294967294, %s3048_s26  }
  0x14   : > { %p67_p0 = scmp.ne.s32.totalorder %s3032_s22, %s3028_s21  ;;  %p3639_p1 = scmp.eq.s32.totalorder %s3164_s27, 0 }
  0x15   : > { %p329_p2 = scmp.eq.s32.totalorder %s3164_s27, 1  ;;  %p335_p3 = scmp.eq.s32.totalorder %s2214_s28, 1 }
  0x16   : > { %p3173_p4 = por %p3639_p1, %p67_p0  ;;  %p2215_p5 = scmp.ge.s32.totalorder %s3048_s26, 1 }
  0x17   : > { %p3178_p6 = por %p335_p3, %p67_p0  ;;  %p342_p7 = scmp.lt.s32.totalorder %s3048_s26, 3 }
  0x18   : > { %s3050_s14 = smov [#allocation9]   ;;  %s3051_s17 = smov [#allocation10]  }
  0x19   : > { %s3657_s30 = scalar_select %p3178_p6, 1, 0 }
  0x1a   : > { %p3183_p8 = pnand %p2215_p5, %p342_p7  ;;  %s360_s15 = sshll.u32 %s3050_s14, 4  ;;  %s361_s15 = int_to_ptr.vmem [resolvable:$true] %s360_s15 }
  0x1b   : > { %3658 = sst [smem:[#allocation24_spill]] %s3657_s30  ;;  %s376_s18 = sshll.u32 %s3051_s17, 4  ;;  %s377_s18 = int_to_ptr.vmem [resolvable:$true] %s376_s18 }
  0x1c   : > { %p2601_p9 = pneg %p3183_p8  ;;  %s3052_s19 = smov [#allocation12]  }
  0x1d   : > { %s392_s20 = sshll.u32 %s3052_s19, 4  ;;  %s2803_s28 = scalar_lea.vmem %s361_s15, 1024  ;;  %s393_s20 = int_to_ptr.vmem [resolvable:$true] %s392_s20 }
  0x1e   : > { %p3192_p11 = pnand %p2601_p9, %p3639_p1  ;;  %p2804_p13 = scmp.ne.s32.totalorder %s361_s15, %s2803_s28 }
  0x1f   : > { %p2811_p5 = scmp.lt.s32.totalorder %s361_s15, %s361_s15  ;;  %p2812_p7 = scmp.lt.s32.totalorder %s2803_s28, %s2803_s28 }
  0x20   : > { %p2794_p12 = pneg %p3192_p11 }
  0x21   : > { %p2813_p9 = por %p2812_p7, %p2811_p5 }
  0x22   : > { %p2806_p0 = pnand %p2804_p13, %p2794_p12 }
  0x24   : > { %p2807_p3 = pneg %p2806_p0 }
  0x26   : > { %p2814_p10 = pnand %p2813_p9, %p2807_p3 }
  0x28   : > { %2817 = shalt.err (!%p2814_p10)
}
  0x29   : > { %s3640_s14 = smov 64   ;;  %s3641_s17 = smov 4  }
  0x2a   : > { %s3661_s4 = sld [smem:[#allocation29_spill]]  ;;  %s2829_s21 = scalar_lea.vmem %s377_s18, 1024 }
  0x2b   : > { %p2830_p13 = scmp.ne.s32.totalorder %s377_s18, %s2829_s21  ;;  %p2837_p3 = scmp.lt.s32.totalorder %s377_s18, %s377_s18 }
  0x2c   : > { %p2838_p10 = scmp.lt.s32.totalorder %s2829_s21, %s2829_s21 }
  0x2d   : > { %p2832_p0 = pnand %p2830_p13, %p2794_p12 }
  0x2e   : > { %p2839_p7 = por %p2838_p10, %p2837_p3 }
  0x2f   : > { %p2833_p5 = pneg %p2832_p0 }
  0x30   : > { %2604 = dma.hbm_to_vmem [thread:$0]  (!%p3192_p11), %s3661_s4, 1024, %s361_s15, [#allocation8], %s3640_s14, %s3640_s14, %s3641_s17  }
  0x31   : > { %p2840_p9 = pnand %p2839_p7, %p2833_p5 }
  0x33   : > { %2843 = shalt.err (!%p2840_p9)
}
  0x34   : > { %s3662_s6 = sld [smem:[#allocation30_spill]]  ;;  %s2855_s30 = scalar_lea.vmem %s393_s20, 1024 }
  0x35   : > { %p2856_p1 = scmp.ne.s32.totalorder %s393_s20, %s2855_s30  ;;  %p2863_p3 = scmp.lt.s32.totalorder %s393_s20, %s393_s20 }
  0x36   : > { %p2864_p5 = scmp.lt.s32.totalorder %s2855_s30, %s2855_s30 }
  0x37   : > { %p2858_p13 = pnand %p2856_p1, %p2794_p12 }
  0x38   : > { %p2865_p10 = por %p2864_p5, %p2863_p3 }
  0x39   : > { %p2859_p0 = pneg %p2858_p13 }
  0x3a   : > { %2607 = dma.hbm_to_vmem [thread:$0]  (!%p3192_p11), %s3662_s6, 1024, %s377_s18, [#allocation11], %s3640_s14, %s3640_s14, %s3641_s17  }
  0x3b   : > { %p2866_p7 = pnand %p2865_p10, %p2859_p0 }
  0x3d   : > { %2869 = shalt.err (!%p2866_p7)
}
  0x3e   : > { %s3663_s8 = sld [smem:[#allocation31_spill]]  ;;  %s3055_s15 = smov [#allocation13]  }
  0x3f   : > { %s408_s18 = sshll.u32 %s3055_s15, 4  ;;  %s409_s18 = int_to_ptr.vmem [resolvable:$true] %s408_s18 }
  0x40   : > { %s2881_s19 = scalar_lea.vmem %s409_s18, 1024  ;;  %p2889_p0 = scmp.lt.s32.totalorder %s409_s18, %s409_s18 }
  0x41   : > { %p2882_p1 = scmp.ne.s32.totalorder %s409_s18, %s2881_s19  ;;  %p2890_p3 = scmp.lt.s32.totalorder %s2881_s19, %s2881_s19 }
  0x43   : > { %p2884_p9 = pnand %p2882_p1, %p2794_p12  ;;  %p2891_p5 = por %p2890_p3, %p2889_p0 }
  0x44   : > { %2610 = dma.hbm_to_vmem [thread:$0]  (!%p3192_p11), %s3663_s8, 1024, %s393_s20, [#allocation11], %s3640_s14, %s3640_s14, %s3641_s17  }
  0x45   : > { %p2885_p13 = pneg %p2884_p9 }
  0x47   : > { %p2892_p10 = pnand %p2891_p5, %p2885_p13 }
  0x49   : > { %2895 = shalt.err (!%p2892_p10)
}
  0x4a   : > { %s3664_s10 = sld [smem:[#allocation32_spill]]  ;;  %s45_s16 = sadd.s32 1, %s3044_s25 }
  0x4b   : > { %s54_s30 = sadd.s32 1, %s3036_s23  ;;  %p47_p12 = scmp.ge.s32.totalorder %s45_s16, 2 }
  0x4c   : > { %p61_p7 = scmp.ne.s32.totalorder %s3036_s23, %s3032_s22  ;;  %p62_p1 = scmp.eq.s32.totalorder %s3048_s26, 0 }
  0x4d   : > { %p2629_p9 = scmp.lt.s32.totalorder %s3048_s26, 2  ;;  %s3694_s16 = smov (%p47_p12, %s45_s16), 0 }
  0x4e   : > { %3665 = sst [smem:[#allocation25_spill]] %s3694_s16  ;;  %p63_p13 = por %p62_p1, %p61_p7 }
  0x4f   : > { %p3252_p0 = por %p329_p2, %p61_p7  ;;  %s49_s21 = ssub.s32 %s3044_s25, %s3694_s16 }
  0x50   : > { %2613 = dma.hbm_to_vmem [thread:$0]  (!%p3192_p11), %s3664_s10, 1024, %s409_s18, [#allocation14], %s3640_s14, %s3640_s14, %s3641_s17  }
  0x51   : > { %s3666_s12 = scalar_select %p3252_p0, 1, 0 }
  0x52   : > { %s425_s15 = sand.u32 1, %s3036_s23   ;;  %p52_p11 = scmp.eq.s32.totalorder %s49_s21, 0 }
  0x53   : > { %3667 = sst [smem:[#allocation26_spill]] %s3666_s12  ;;  %s3259_s18 = sshll.u32 %s425_s15, 4 }
  0x54   : > { %s3642_s19 = sshll.u32 %s3044_s25, 8  ;;  %s3669_s0 = sld [smem:[#allocation28_spill]] }
  0x55   : > { %s3263_s20 = scalar_select %p52_p11, %s3036_s23, %s54_s30  }
  0x56   : > { %s429_s4 = scalar_lea.vmem [#allocation4], %s3259_s18  ;;  %p3273_p2 = pnand %p2629_p9, %p63_p13 }
  0x57   : > { %3668 = sst [smem:[#allocation27_spill]] %s3263_s20  ;;  %s438_s6 = sshll.u32 %s429_s4, 4  ;;  %s439_s6 = int_to_ptr.vmem [resolvable:$true] %s438_s6 }
  0x58   : > { %s426_s21 = scalar_lea.sflag [#allocation5], %s425_s15  ;;  %p2898_p3 = pneg %p3273_p2 }
  0x59   : > { %s2909_s30 = scalar_lea.vmem %s439_s6, 256  ;;  %s3056_s14 = smov [#allocation4]  }
  0x5a   : > { %s437_s17 = scalar_lea.hbm %s3669_s0, %s3642_s19  ;;  %p2910_p5 = scmp.ne.s32.totalorder %s439_s6, %s2909_s30 }
  0x5b   : > { %s2914_s28 = sshll.u32 %s3056_s14, 4  ;;  %s2915_s28 = int_to_ptr.vmem [resolvable:$false] %s2914_s28 }
  0x5c   : > { %p2912_p10 = pnand %p2910_p5, %p2898_p3  ;;  %s2916_s4 = scalar_lea.vmem %s2915_s28, 512 }
  0x5d   : > { %p2917_p7 = scmp.lt.s32.totalorder %s439_s6, %s2915_s28  ;;  %p2918_p1 = scmp.lt.s32.totalorder %s2916_s4, %s2909_s30 }
  0x5e   : > { %p2913_p12 = pneg %p2912_p10 }
  0x5f   : > { %p2919_p9 = por %p2918_p1, %p2917_p7 }
  0x61   : > { %p2920_p13 = pnand %p2919_p9, %p2913_p12 }
  0x63   : > { %2923 = shalt.err (!%p2920_p13)
}
  0x64   : > { %s3057_s19 = smov 128   ;;  %s3058_s15 = smov 8  }
  0x65   : > { %2617 = dma.hbm_to_vmem [thread:$0]  (!%p3273_p2), %s437_s17, 256, %s439_s6, %s426_s21, %s3057_s19, %s3057_s19, %s3058_s15  }
  0x66   : > { %s3671_s0 = sshll.u32 %s3044_s25, 8  ;;  %s452_s20 = scalar_lea.vmem [#allocation7], %s3259_s18 }
  0x67   : > { %s458_s14 = scalar_lea.hbm %s3624_s1, %s3671_s0  ;;  %s459_s28 = sshll.u32 %s452_s20, 4  ;;  %s460_s28 = int_to_ptr.vmem [resolvable:$true] %s459_s28 }
  0x68   : > { %s448_s30 = sand.u32 1, %s3048_s26   ;;  %s2937_s23 = scalar_lea.vmem %s460_s28, 256 }
  0x69   : > { %s449_s4 = scalar_lea.sflag [#allocation8], %s448_s30  ;;  %p2938_p11 = scmp.ne.s32.totalorder %s460_s28, %s2937_s23 }
  0x6a   : > { %s3059_s12 = smov [#allocation7]  }
  0x6b   : > { %p2940_p5 = pnand %p2938_p11, %p2898_p3  ;;  %s2942_s11 = sshll.u32 %s3059_s12, 4  ;;  %s2943_s11 = int_to_ptr.vmem [resolvable:$false] %s2942_s11 }
  0x6c   : > { %s2944_s6 = scalar_lea.vmem %s2943_s11, 512  ;;  %p2945_p12 = scmp.lt.s32.totalorder %s460_s28, %s2943_s11 }
  0x6d   : > { %p2941_p10 = pneg %p2940_p5  ;;  %p2946_p7 = scmp.lt.s32.totalorder %s2944_s6, %s2937_s23 }
  0x6f   : > { %p2947_p1 = por %p2946_p7, %p2945_p12 }
  0x71   : > { %p2948_p9 = pnand %p2947_p1, %p2941_p10 }
  0x73   : > { %2951 = shalt.err (!%p2948_p9)
}
  0x74   : > { %s3672_s0 = smov 4   ;;  %s3673_s10 = smov 64  }
  0x75   : > { %2620 = dma.hbm_to_vmem [thread:$0]  (!%p3273_p2), %s458_s14, 256, %s460_s28, %s449_s4, %s3673_s10, %s3673_s10, %s3672_s0  }
  0x76   : > { %471 = sbr.rel (%p3183_p8) target bundleno = 1749 (0x6d5), region = 68  ;;  %s3302_s17 = sand.u32 (!%p3183_p8), 1, %s3032_s22  }
  0x77   : > { %s3305_s11 = sshll.u32 (!%p3183_p8), %s3302_s17, 4  ;;  %s474_s23 = scalar_lea.sflag (!%p3183_p8), [#allocation5], %s3302_s17 }
  0x78   : > { %s3309_s16 = scalar_lea.vmem (!%p3183_p8), [#allocation4], %s3305_s11 }
  0x7b   : > { %3003 = dma.done.wait (%p3173_p4), %s474_s23, 256  }
  0x7c   : > { %3005 = vsyncadd (%p3173_p4), %s474_s23, 4294967040  ;;  %s482_s8 = sand.u32 1, %s3164_s27   ;;  %s486_s12 = scalar_lea.vmem [#allocation7], %s3305_s11 }
  0x7d   : > { %s483_s13 = scalar_lea.sflag [#allocation8], %s482_s8 }
  0x7e   : > { %3007 = dma.done.wait (%p3173_p4), %s483_s13, 256  }
  0x7f   : > { %3009 = vsyncadd (%p3173_p4), %s483_s13, 4294967040  ;;  %p3674_p8 = scmp.eq.s32.totalorder %s3164_s27, 0 }
  0x81   : > { %3011 = dma.done.wait (%p3674_p8), [#allocation8], 1024   ;;  %p3675_p2 = pmov %p3674_p8 }
  0x83   : > { %3013 = vsyncadd (%p3675_p2), [#allocation8], 4294966272  ;;  %p3676_p3 = pmov %p3675_p2 }
  0x84   : > { %p3677_p13 = pmov %p3675_p2 }
  0x85   : > { %3015 = dma.done.wait (%p3676_p3), [#allocation11], 2048  }
  0x86   : > { %3017 = vsyncadd (%p3677_p13), [#allocation11], 4294965248  ;;  %p3678_p11 = pmov %p3675_p2 }
  0x87   : > { %p3679_p5 = pmov %p3675_p2 }
  0x88   : > { %3019 = dma.done.wait (%p3678_p11), [#allocation14], 1024  }
  0x89   : > { %3021 = vsyncadd (%p3679_p5), [#allocation14], 4294966272  ;;  %v2348_v0 = vld [vmem:[%s486_s12] sm:$0xff]   ;;  %v2355_v1 = vld [vmem:[%s486_s12 + $0x8] sm:$0xff]   ;;  %v3060_v48 = vmov 0.0   ;;  %vm3061_vm0 = vmmov 0  }
  0x8a   : > { %v2349_v2 = vunpack.c.l.bf16 %v2348_v0  ;;  %v2353_v3 = vunpack.c.l.bf16 %v2355_v1  ;;  %v2350_v4 = vunpack.c.h.bf16 %v2348_v0  ;;  %v2354_v5 = vunpack.c.h.bf16 %v2355_v1  ;;  %v1033_v6 = vld [vmem:[%s3309_s16] sm:$0xff]  ;;  %v1034_v7 = vld [vmem:[%s3309_s16 + $0x8] sm:$0xff]  ;;  %s3062_s28 = smov 96   ;;  %s3063_s30 = smov 64  }
  0x8b   : > { %v2698_v32 = vld [vmem:[#allocation10 + $0x38] sm:$0xff]   ;;  %v2700_v34 = vld [vmem:[#allocation10 + $0x30] sm:$0xff]   ;;  %v2702_v36 = vld [vmem:[#allocation10 + $0x28] sm:$0xff]   ;;  %vm938_vm1 = vcmask 257024   ;;  %vm1239_vm2 = vcmask 261120   ;;  %s3064_s4 = smov 32  }
  0x8c   : > { %565 = vadd.xlane.f32.xlu0 %v2349_v2  ;;  %569 = vadd.xlane.f32.xlu1 %v2353_v3  ;;  %v2699_v33 = vld [vmem:[#allocation12 + $0x38] sm:$0xff]   ;;  %v2701_v35 = vld [vmem:[#allocation12 + $0x30] sm:$0xff]   ;;  %v2703_v37 = vld [vmem:[#allocation12 + $0x28] sm:$0xff]   ;;  %s3680_s8 = sld [smem:[#allocation33_spill]]  ;;  %s547_s13 = scalar_lea.vmem [#allocation15], %s3305_s11 }
  0x8d   : > { %2423 = vmatprep.subr.bf16.mxu0 %v2698_v32  ;;  %2443 = vmatprep.subr.bf16.mxu1 %v2699_v33  ;;  %v2704_v38 = vld [vmem:[#allocation10 + $0x20] sm:$0xff]   ;;  %v2706_v40 = vld [vmem:[#allocation10 + $0x18] sm:$0xff]   ;;  %v2708_v42 = vld [vmem:[#allocation10 + $0x10] sm:$0xff]   ;;  %s2065_s12 = sshll.u32 %s547_s13, 4  ;;  %s2346_s29 = sshll.u32 %s3040_s24, 8  ;;  %s3569_s12 = int_to_ptr.vmem [resolvable:$true] %s2065_s12 }
  0x8e   : > { %2424 = vmatpush3.bf16.msra.mxu0 %v2698_v32  ;;  %2444 = vmatpush3.bf16.msra.mxu1 %v2699_v33  ;;  %v2705_v39 = vld [vmem:[#allocation12 + $0x20] sm:$0xff]   ;;  %v2707_v41 = vld [vmem:[#allocation12 + $0x18] sm:$0xff]   ;;  %v2709_v43 = vld [vmem:[#allocation12 + $0x10] sm:$0xff]   ;;  %s3682_s20 = sld [smem:[#allocation34_spill]]  ;;  %s2050_s11 = scalar_lea.sflag [#allocation6], %s3302_s17 }
  0x8f   : > { %2425 = vmatprep.subr.bf16.mxu0 %v2700_v34  ;;  %2445 = vmatprep.subr.bf16.mxu1 %v2701_v35  ;;  %v2710_v44 = vld [vmem:[#allocation10 + $0x8] sm:$0xff]   ;;  %v2712_v46 = vld [vmem:[#allocation10] sm:$0xff]   ;;  %v2719_v32 = vld [vmem:[#allocation9 + $0x10] sm:$0xff]   ;;  %s2952_s15 = scalar_lea.vmem %s3569_s12, 256  ;;  %s3065_s24 = smov [#allocation15]  }
  0x90   : > { %567 = vadd.xlane.f32.xlu0 %v2350_v4  ;;  %571 = vadd.xlane.f32.xlu1 %v2354_v5  ;;  %v2711_v45 = vld [vmem:[#allocation12 + $0x8] sm:$0xff]   ;;  %v2713_v47 = vld [vmem:[#allocation12] sm:$0xff]   ;;  %p2953_p4 = scmp.ne.s32.totalorder %s3569_s12, %s2952_s15  ;;  %s2956_s14 = sshll.u32 %s3065_s24, 4  ;;  %s2957_s14 = int_to_ptr.vmem [resolvable:$false] %s2956_s14 }
  0x91   : > { %v2356_v63 = vld [vmem:[%s3625_s2] ss:$0 sm:$0xff]  ;;  %p2959_p7 = scmp.lt.s32.totalorder %s3569_s12, %s2957_s14 }
  0x92   : > { %2426 = vmatpush3.bf16.msra.mxu0 %v2700_v34  ;;  %2446 = vmatpush3.bf16.msra.mxu1 %v2701_v35  ;;  %v2720_v35 = vld [vmem:[#allocation9 + $0x8] sm:$0xff]   ;;  %p2954_p10 = pnand %p2953_p4, %p3252_p0 }
  0x93   : > { %2427 = vmatprep.subr.bf16.mxu0 %v2702_v36  ;;  %2447 = vmatprep.subr.bf16.mxu1 %v2703_v37 }
  0x94   : > { %1035 = vadd.xlane.f32.xlu0 %v1033_v6  ;;  %1037 = vadd.xlane.f32.xlu1 %v1034_v7  ;;  %s3574_s21 = scalar_lea.hbm %s3682_s20, %s2346_s29  ;;  %p2955_p12 = pneg %p2954_p10 }
  0x96   : > { %2428 = vmatpush3.bf16.msra.mxu0 %v2702_v36  ;;  %2448 = vmatpush3.bf16.msra.mxu1 %v2703_v37 }
  0x97   : > { %2429 = vmatprep.subr.bf16.mxu0 %v2704_v38  ;;  %2449 = vmatprep.subr.bf16.mxu1 %v2705_v39 }
  0x9a   : > { %2430 = vmatpush3.bf16.msra.mxu0 %v2704_v38  ;;  %2450 = vmatpush3.bf16.msra.mxu1 %v2705_v39  ;;  %v2721_v38 = vld [vmem:[#allocation9] sm:$0xff]  }
  0x9b   : > { %2431 = vmatprep.subr.bf16.mxu0 %v2706_v40  ;;  %2451 = vmatprep.subr.bf16.mxu1 %v2707_v41 }
  0x9e   : > { %2432 = vmatpush3.bf16.msra.mxu0 %v2706_v40  ;;  %2452 = vmatpush3.bf16.msra.mxu1 %v2707_v41 }
  0x9f   : > { %2433 = vmatprep.subr.bf16.mxu0 %v2708_v42  ;;  %2453 = vmatprep.subr.bf16.mxu1 %v2709_v43 }
  0xa2   : > { %2434 = vmatpush3.bf16.msra.mxu0 %v2708_v42  ;;  %2454 = vmatpush3.bf16.msra.mxu1 %v2709_v43 }
  0xa3   : > { %2435 = vmatprep.subr.bf16.mxu0 %v2710_v44  ;;  %2455 = vmatprep.subr.bf16.mxu1 %v2711_v45 }
  0xa6   : > { %2436 = vmatpush3.bf16.msra.mxu0 %v2710_v44  ;;  %2456 = vmatpush3.bf16.msra.mxu1 %v2711_v45 }
  0xa7   : > { %2437 = vmatprep.subr.bf16.mxu0 %v2712_v46  ;;  %2457 = vmatprep.subr.bf16.mxu1 %v2713_v47 }
  0xaa   : > { %2438 = vmatpush3.bf16.msra.mxu0 %v2712_v46  ;;  %2458 = vmatpush3.bf16.msra.mxu1 %v2713_v47 }
  0xab   : > { %2463 = vmatprep.subr.bf16.mxu0 %v3060_v48  ;;  %2483 = vmatprep.subr.bf16.mxu1 %v3060_v48 }
 0x115   : > { %v566_v8 = vpop.xlane.xlu0 %565  ;;  %v570_v9 = vpop.xlane.xlu1 %569 }
 0x116   : > { %v574_v10 = vmul.f32 0.0078125, %v566_v8  ;;  %v576_v11 = vmul.f32 0.0078125, %v570_v9 }
 0x118   : > { %v3335_v12 = vsub.f32 %v2349_v2, %v574_v10  ;;  %v3337_v13 = vsub.f32 %v2353_v3, %v576_v11 }
 0x119   : > { %v568_v14 = vpop.xlane.xlu0 %567  ;;  %v572_v15 = vpop.xlane.xlu1 %571 }
 0x11a   : > { %v575_v16 = vmul.f32 0.0078125, %v568_v14  ;;  %v582_v17 = vmul.f32 %v3335_v12, %v3335_v12  ;;  %v577_v18 = vmul.f32 0.0078125, %v572_v15  ;;  %v584_v21 = vmul.f32 %v3337_v13, %v3337_v13 }
 0x11c   : > { %v3341_v19 = vsub.f32 %v2350_v4, %v575_v16  ;;  %586 = vadd.xlane.f32.xlu0 %v582_v17  ;;  %v3343_v20 = vsub.f32 %v2354_v5, %v577_v18  ;;  %v2357_v4 = vld [vmem:[%s3626_s3] ss:$0 sm:$0xff] }
 0x11d   : > { %v1036_v22 = vpop.xlane.xlu0 %1035  ;;  %v1038_v23 = vpop.xlane.xlu1 %1037 }
 0x11e   : > { %v1040_v24 = vmul.f32 0.0078125, %v1036_v22  ;;  %v583_v25 = vmul.f32 %v3341_v19, %v3341_v19  ;;  %v1041_v26 = vmul.f32 0.0078125, %v1038_v23  ;;  %v585_v29 = vmul.f32 %v3343_v20, %v3343_v20  ;;  %v2714_v22 = vld [vmem:[#allocation9 + $0x38] sm:$0xff]  }
 0x120   : > { %v3349_v27 = vsub.f32 %v1033_v6, %v1040_v24  ;;  %590 = vadd.xlane.f32.xlu0 %v584_v21  ;;  %588 = vadd.xlane.f32.xlu1 %v583_v25  ;;  %v3351_v28 = vsub.f32 %v1034_v7, %v1041_v26  ;;  %v2715_v25 = vld [vmem:[#allocation9 + $0x30] sm:$0xff]   ;;  %v2717_v26 = vld [vmem:[#allocation9 + $0x20] sm:$0xff]  }
 0x122   : > { %v1044_v30 = vmul.f32 %v3349_v27, %v3349_v27  ;;  %v1045_v31 = vmul.f32 %v3351_v28, %v3351_v28 }
 0x124   : > { %592 = vadd.xlane.f32.xlu1 %v585_v29  ;;  %1046 = vadd.xlane.f32.xlu0 %v1044_v30  ;;  %v2718_v29 = vld [vmem:[#allocation9 + $0x18] sm:$0xff]  }
 0x128   : > { %1048 = vadd.xlane.f32.xlu1 %v1045_v31 }
 0x1a5   : > { %v587_v49 = vpop.xlane.xlu0 %586 }
 0x1a6   : > { %v594_v50 = vmul.f32 0.0078125, %v587_v49 }
 0x1a8   : > { %v598_v51 = vadd.f32 1e-05, %v594_v50 }
 0x1a9   : > { %v589_v52 = vpop.xlane.xlu1 %588  ;;  %v591_v53 = vpop.xlane.xlu0 %590 }
 0x1aa   : > { %2746 = vrsqrt.f32 %v598_v51  ;;  %v595_v54 = vmul.f32 0.0078125, %v589_v52  ;;  %v596_v55 = vmul.f32 0.0078125, %v591_v53 }
 0x1ac   : > { %v599_v56 = vadd.f32 1e-05, %v595_v54  ;;  %v600_v57 = vadd.f32 1e-05, %v596_v55 }
 0x1ad   : > { %v593_v58 = vpop.xlane.xlu1 %592  ;;  %v1047_v14 = vpop.xlane.xlu0 %1046 }
 0x1ae   : > { %2748 = vrsqrt.f32 %v599_v56  ;;  %v597_v59 = vmul.f32 0.0078125, %v593_v58  ;;  %v1050_v18 = vmul.f32 0.0078125, %v1047_v14 }
 0x1af   : > { %2750 = vrsqrt.f32 %v600_v57 }
 0x1b0   : > { %v601_v60 = vadd.f32 1e-05, %v597_v59  ;;  %v1052_v24 = vadd.f32 1e-05, %v1050_v18 }
 0x1b1   : > { %v1049_v8 = vpop.xlane.xlu1 %1048 }
 0x1b2   : > { %2752 = vrsqrt.f32 %v601_v60  ;;  %v1051_v15 = vmul.f32 0.0078125, %v1049_v8 }
 0x1b4   : > { %v1053_v23 = vadd.f32 1e-05, %v1051_v15 }
 0x1b6   : > { %2754 = vrsqrt.f32 %v1053_v23 }
 0x1b7   : > { %v2747_v61 = vpop.eup %2746  ;;  %2756 = vrsqrt.f32 %v1052_v24 }
 0x1b8   : > { %v606_v62 = vmul.f32 %v2747_v61, %v3335_v12 }
 0x1ba   : > { %v616_v3 = vmul.f32 %v2356_v63, %v606_v62 }
 0x1bb   : > { %v2749_v0 = vpop.eup %2748 }
 0x1bc   : > { %v2751_v1 = vpop.eup %2750  ;;  %v607_v2 = vmul.f32 %v2749_v0, %v3341_v19  ;;  %v626_v9 = vadd.f32 %v2357_v4, %v616_v3 }
 0x1bd   : > { %v608_v5 = vmul.f32 %v2751_v1, %v3337_v13 }
 0x1be   : > { %v617_v6 = vmul.f32 %v2356_v63, %v607_v2 }
 0x1bf   : > { %v2753_v7 = vpop.eup %2752  ;;  %v618_v12 = vmul.f32 %v2356_v63, %v608_v5 }
 0x1c0   : > { %v627_v10 = vadd.f32 %v2357_v4, %v617_v6  ;;  %v609_v11 = vmul.f32 %v2753_v7, %v3343_v20  ;;  %v2716_v20 = vld [vmem:[#allocation9 + $0x28] sm:$0xff]  }
 0x1c1   : > { %v628_v19 = vadd.f32 %v2357_v4, %v618_v12 }
 0x1c2   : > { %v630_v16 = vpack.c.bf16 %v627_v10, %v626_v9  ;;  %v619_v17 = vmul.f32 %v2356_v63, %v609_v11  ;;  %v2285_v11 = vld [vmem:[%s3628_s5] ss:$0 sm:$0xff] }
 0x1c3   : > { %v2755_v30 = vpop.eup %2754 }
 0x1c4   : > { %2439 = vmatprep.mubr.bf16.mxu0 %v630_v16  ;;  %2459 = vmatprep.mubr.bf16.mxu1 %v630_v16  ;;  %v629_v21 = vadd.f32 %v2357_v4, %v619_v17  ;;  %v2757_v31 = vpop.eup %2756  ;;  %v1057_v33 = vmul.f32 %v2755_v30, %v3351_v28  ;;  %v2244_v28 = vld [vmem:[%s3632_s9] ss:$0 sm:$0xff] }
 0x1c5   : > { %v1056_v34 = vmul.f32 %v2757_v31, %v3349_v27  ;;  %v2235_v27 = vld [vmem:[%s3630_s7] ss:$0 sm:$0xff] }
 0x1c6   : > { %v631_v13 = vpack.c.bf16 %v629_v21, %v628_v19  ;;  %v1065_v36 = vmul.f32 %v2356_v63, %v1057_v33 }
 0x1c7   : > { %v1064_v37 = vmul.f32 %v2356_v63, %v1056_v34 }
 0x1c8   : > { %2440 = vmatmul.mubr.bf16.vlgmr.msra.gmra.mxu0 %v631_v13  ;;  %2460 = vmatmul.mubr.bf16.vlgmr.msra.gmra.mxu1 %v631_v13  ;;  %v1073_v39 = vadd.f32 %v2357_v4, %v1065_v36 }
 0x1c9   : > { %2464 = vmatpush3.bf16.msra.mxu0 %v2714_v22  ;;  %2479 = vmatprep.mubr.msk.bf16.mxu0 %vm3061_vm0, %v3060_v48  ;;  %v1072_v40 = vadd.f32 %v2357_v4, %v1064_v37 }
 0x1ca   : > { %2465 = vmatprep.subr.bf16.mxu0 %v3060_v48  ;;  %2487 = vmatprep.mubr.msk.bf16.mxu1 %vm3061_vm0, %v3060_v48 }
 0x1cb   : > { %v1074_v41 = vpack.c.bf16 %v1073_v39, %v1072_v40 }
 0x1cd   : > { %2466 = vmatpush3.bf16.msra.mxu0 %v2715_v25 }
 0x1ce   : > { %2467 = vmatprep.subr.bf16.mxu0 %v3060_v48 }
 0x1d1   : > { %2468 = vmatpush3.bf16.msra.mxu0 %v2716_v20 }
 0x1d2   : > { %2469 = vmatprep.subr.bf16.mxu0 %v3060_v48 }
 0x1d5   : > { %2470 = vmatpush3.bf16.msra.mxu0 %v2717_v26 }
 0x1d6   : > { %2471 = vmatprep.subr.bf16.mxu0 %v3060_v48 }
 0x1d9   : > { %2472 = vmatpush3.bf16.msra.mxu0 %v2718_v29 }
 0x1da   : > { %2473 = vmatprep.subr.bf16.mxu0 %v3060_v48 }
 0x1dd   : > { %2474 = vmatpush3.bf16.msra.mxu0 %v2719_v32 }
 0x1de   : > { %2475 = vmatprep.subr.bf16.mxu0 %v3060_v48 }
 0x1e1   : > { %2476 = vmatpush3.bf16.msra.mxu0 %v2720_v35 }
 0x1e2   : > { %2477 = vmatprep.subr.bf16.mxu0 %v3060_v48 }
 0x1e5   : > { %2478 = vmatpush3.bf16.msra.mxu0 %v2721_v38 }
 0x1e6   : > { %2499 = vmatprep.subr.bf16.mxu0 %v3060_v48 }
 0x1e8   : > { %2480 = vmatmul.mubr.bf16.vlgmr.msra.gmra.mxu0 %v1074_v41 }
 0x1e9   : > { %2503 = vmatprep.mubr.msk.bf16.mxu0 %vm3061_vm0, %v3060_v48 }
 0x288   : > { %v2441_v42 = vpop.f32.mrf.mxu0  ;;  %v2461_v43 = vpop.f32.mrf.mxu1 }
 0x289   : > { %v746_v44 = vadd.f32 %v2441_v42, %v2235_v27  ;;  %v868_v45 = vadd.f32 %v2461_v43, %v2244_v28 }
 0x28a   : > { %v737_v46 = vpop.f32.mrf.mxu0  ;;  %v859_v47 = vpop.f32.mrf.mxu1 }
 0x28b   : > { %v2340_v49 = vpack.c.bf16 %v746_v44, %v746_v44  ;;  %v2344_v50 = vpack.c.bf16 %v868_v45, %v868_v45  ;;  %v738_v51 = vadd.f32 %v2235_v27, %v737_v46  ;;  %v860_v52 = vadd.f32 %v2244_v28, %v859_v47 }
 0x28c   : > { %v2442_v53 = vpop.f32.mrf.mxu0  ;;  %v2462_v54 = vpop.f32.mrf.mxu1 }
 0x28d   : > { %941 = vst.msk [vmem:[#allocation2 + $0x8] sm:$0xf] %vm938_vm1, %v2340_v49  ;;  %1019 = vst.msk [vmem:[#allocation3 + $0x8] sm:$0xf] %vm938_vm1, %v2344_v50  ;;  %v2338_v55 = vpack.c.bf16 %v738_v51, %v738_v51  ;;  %v2342_v56 = vpack.c.bf16 %v860_v52, %v860_v52  ;;  %v749_v57 = vadd.f32 %v2442_v53, %v2235_v27 }
 0x28e   : > { %v871_v58 = vadd.f32 %v2462_v54, %v2244_v28  ;;  %v740_v59 = vpop.f32.mrf.mxu0  ;;  %v862_v60 = vpop.f32.mrf.mxu1 }
 0x28f   : > { %939 = vst.msk [vmem:[#allocation2] sm:$0xf] %vm938_vm1, %v2338_v55  ;;  %1017 = vst.msk [vmem:[#allocation3] sm:$0xf] %vm938_vm1, %v2342_v56  ;;  %v753_v61 = vpack.c.bf16 %v749_v57, %v746_v44  ;;  %v2341_v62 = vpack.c.bf16 %v749_v57, %v749_v57  ;;  %v741_v1 = vadd.f32 %v2235_v27, %v740_v59 }
 0x290   : > { %v3397_v63 = vpack.c.bf16 %v871_v58, %v868_v45  ;;  %v2345_v0 = vpack.c.bf16 %v871_v58, %v871_v58  ;;  %v863_v2 = vadd.f32 %v2244_v28, %v862_v60 }
 0x291   : > { %942 = vst.msk [vmem:[#allocation2 + $0xc] sm:$0xf] %vm938_vm1, %v2341_v62  ;;  %880 = vrot.lane.b32.xlu0 %v753_v61, %s3062_s28  ;;  %v752_v3 = vpack.c.bf16 %v741_v1, %v738_v51  ;;  %v2339_v4 = vpack.c.bf16 %v741_v1, %v741_v1 }
 0x292   : > { %1020 = vst.msk [vmem:[#allocation3 + $0xc] sm:$0xf] %vm938_vm1, %v2345_v0  ;;  %v3402_v5 = vpack.c.bf16 %v863_v2, %v860_v52  ;;  %v2343_v6 = vpack.c.bf16 %v863_v2, %v863_v2 }
 0x293   : > { %940 = vst.msk [vmem:[#allocation2 + $0x4] sm:$0xf] %vm938_vm1, %v2339_v4  ;;  %878 = vrot.lane.b32.xlu1 %v752_v3, %s3062_s28 }
 0x294   : > { %1018 = vst.msk [vmem:[#allocation3 + $0x4] sm:$0xf] %vm938_vm1, %v2343_v6 }
 0x295   : > { %882 = vrot.lane.b32.xlu0 %v752_v3, %s3063_s30 }
 0x297   : > { %884 = vrot.lane.b32.xlu1 %v753_v61, %s3063_s30 }
 0x298   : > { %v2722_v7 = vld [vmem:[#allocation2 + $0x8] sm:$0xff]  }
 0x299   : > { %v1247_v8 = vsel %vm1239_vm2, %v2722_v7, 0  ;;  %v2729_v52 = vld [vmem:[#allocation3 + $0x8] sm:$0xff]  }
 0x29a   : > { %2484 = vmatpush3.bf16.xpose.msra.mxu1 %v1247_v8  ;;  %v2723_v9 = vld [vmem:[#allocation2] sm:$0xff]  }
 0x29b   : > { %888 = vrot.lane.b32.xlu1 %v753_v61, %s3064_s4  ;;  %2485 = vmatprep.subr.bf16.mxu1 %v3060_v48  ;;  %v1244_v10 = vsel %vm1239_vm2, %v2723_v9, 0  ;;  %v2730_v53 = vld [vmem:[#allocation3] sm:$0xff]  }
 0x29f   : > { %886 = vrot.lane.b32.xlu1 %v752_v3, %s3064_s4 }
 0x2a2   : > { %2486 = vmatpush3.bf16.xpose.msra.mxu1 %v1244_v10 }
 0x2a3   : > { %2491 = vmatprep.subr.bf16.mxu1 %v3060_v48 }
 0x2a8   : > { %v1180_v12 = vpop.f32.mrf.mxu0 }
 0x2a9   : > { %v1181_v15 = vadd.f32 %v2285_v11, %v1180_v12 }
 0x2aa   : > { %v2481_v14 = vpop.f32.mrf.mxu0 }
 0x2ab   : > { %v1187_v19 = vmul.f32 0.17677669, %v1181_v15 }
 0x2ac   : > { %v1183_v16 = vpop.f32.mrf.mxu0 }
 0x2ad   : > { %v1184_v17 = vadd.f32 %v2285_v11, %v1183_v16 }
 0x2ae   : > { %v2482_v18 = vpop.f32.mrf.mxu0 }
 0x2af   : > { %v1188_v21 = vmul.f32 0.17677669, %v1184_v17 }
 0x2b1   : > { %v1189_v22 = vpack.c.bf16 %v1188_v21, %v1187_v19 }
 0x2b3   : > { %2488 = vmatmul.mubr.msk.bf16.vlgmr.msra.gmra.mxu1 %vm1239_vm2, %v1189_v22  ;;  %1191 = vrot.lane.b32.xlu0 %v1189_v22, %s3062_s28 }
 0x2b4   : > { %1193 = vrot.lane.b32.xlu1 %v1189_v22, %s3063_s30  ;;  %2495 = vmatprep.mubr.msk.bf16.mxu1 %vm3061_vm0, %v3060_v48 }
 0x2b7   : > { %1195 = vrot.lane.b32.xlu0 %v1189_v22, %s3064_s4 }
 0x303   : > { %v881_v23 = vpop.permute.xlu0 %880 }
 0x304   : > { %v2259_v13 = vcombine.low %v881_v23, %v881_v23  ;;  %v2260_v24 = vcombine.high %v881_v23, %v881_v23 }
 0x305   : > { %v879_v25 = vpop.permute.xlu1 %878 }
 0x306   : > { %945 = vst.msk [vmem:[#allocation2 + $0x18] sm:$0xf] %vm938_vm1, %v2259_v13  ;;  %946 = vst.msk [vmem:[#allocation2 + $0x1c] sm:$0xf] %vm938_vm1, %v2260_v24  ;;  %v2257_v20 = vcombine.low %v879_v25, %v879_v25  ;;  %v2258_v26 = vcombine.high %v879_v25, %v879_v25 }
 0x307   : > { %v883_v29 = vpop.permute.xlu0 %882 }
 0x308   : > { %v2261_v30 = vcombine.low %v883_v29, %v883_v29  ;;  %v2262_v31 = vcombine.high %v883_v29, %v883_v29  ;;  %943 = vst.msk [vmem:[#allocation2 + $0x10] sm:$0xf] %vm938_vm1, %v2257_v20  ;;  %944 = vst.msk [vmem:[#allocation2 + $0x14] sm:$0xf] %vm938_vm1, %v2258_v26 }
 0x309   : > { %v885_v32 = vpop.permute.xlu1 %884 }
 0x30a   : > { %947 = vst.msk [vmem:[#allocation2 + $0x20] sm:$0xf] %vm938_vm1, %v2261_v30  ;;  %948 = vst.msk [vmem:[#allocation2 + $0x24] sm:$0xf] %vm938_vm1, %v2262_v31  ;;  %v2263_v33 = vcombine.low %v885_v32, %v885_v32  ;;  %v2264_v34 = vcombine.high %v885_v32, %v885_v32 }
 0x30c   : > { %949 = vst.msk [vmem:[#allocation2 + $0x28] sm:$0xf] %vm938_vm1, %v2263_v33  ;;  %950 = vst.msk [vmem:[#allocation2 + $0x2c] sm:$0xf] %vm938_vm1, %v2264_v34 }
 0x30d   : > { %v2724_v35 = vld [vmem:[#allocation2 + $0x18] sm:$0xff]   ;;  %v889_v36 = vpop.permute.xlu1 %888 }
 0x30e   : > { %v2267_v37 = vcombine.low %v889_v36, %v889_v36  ;;  %v2268_v38 = vcombine.high %v889_v36, %v889_v36  ;;  %v1307_v39 = vsel %vm1239_vm2, %v2724_v35, 0 }
 0x30f   : > { %2492 = vmatpush3.bf16.xpose.msra.mxu1 %v1307_v39  ;;  %v2726_v28 = vld [vmem:[#allocation2 + $0x10] sm:$0xff]  }
 0x310   : > { %953 = vst.msk [vmem:[#allocation2 + $0x38] sm:$0xf] %vm938_vm1, %v2267_v37  ;;  %954 = vst.msk [vmem:[#allocation2 + $0x3c] sm:$0xf] %vm938_vm1, %v2268_v38  ;;  %2493 = vmatprep.subr.bf16.mxu1 %v3060_v48  ;;  %v1304_v44 = vsel %vm1239_vm2, %v2726_v28, 0 }
 0x311   : > { %v887_v40 = vpop.permute.xlu1 %886  ;;  %v2727_v45 = vld [vmem:[#allocation2 + $0x20] sm:$0xff]  }
 0x312   : > { %v2265_v41 = vcombine.low %v887_v40, %v887_v40  ;;  %v2266_v27 = vcombine.high %v887_v40, %v887_v40  ;;  %v1364_v46 = vsel %vm1239_vm2, %v2727_v45, 0 }
 0x313   : > { %v2725_v42 = vld [vmem:[#allocation2 + $0x28] sm:$0xff]  }
 0x314   : > { %951 = vst.msk [vmem:[#allocation2 + $0x30] sm:$0xf] %vm938_vm1, %v2265_v41  ;;  %952 = vst.msk [vmem:[#allocation2 + $0x34] sm:$0xf] %vm938_vm1, %v2266_v27  ;;  %v1367_v43 = vsel %vm1239_vm2, %v2725_v42, 0 }
 0x315   : > { %2500 = vmatpush3.bf16.xpose.msra.mxu0 %v1367_v43 }
 0x316   : > { %2501 = vmatprep.subr.bf16.mxu0 %v3060_v48 }
 0x317   : > { %2494 = vmatpush3.bf16.xpose.msra.mxu1 %v1304_v44  ;;  %v2728_v47 = vld [vmem:[#allocation2 + $0x38] sm:$0xff]  }
 0x318   : > { %2507 = vmatprep.subr.bf16.mxu1 %v3060_v48  ;;  %v1427_v51 = vsel %vm1239_vm2, %v2728_v47, 0 }
 0x31b   : > { %v2731_v54 = vld [vmem:[#allocation2 + $0x30] sm:$0xff]  }
 0x31c   : > { %v1424_v55 = vsel %vm1239_vm2, %v2731_v54, 0 }
 0x31d   : > { %2502 = vmatpush3.bf16.xpose.msra.mxu0 %v1364_v46 }
 0x31e   : > { %2515 = vmatprep.subr.bf16.mxu0 %v3060_v48 }
 0x325   : > { %v1192_v49 = vpop.permute.xlu0 %1191 }
 0x326   : > { %v1194_v50 = vpop.permute.xlu1 %1193  ;;  %2496 = vmatmul.mubr.msk.bf16.vlgmr.msra.gmra.mxu1 %vm1239_vm2, %v1192_v49 }
 0x327   : > { %2508 = vmatpush3.bf16.xpose.msra.mxu1 %v1427_v51  ;;  %2504 = vmatmul.mubr.msk.bf16.vlgmr.msra.gmra.mxu0 %vm1239_vm2, %v1194_v50 }
 0x328   : > { %2516 = vmatpush3.bf16.msra.mxu0 %v2729_v52  ;;  %2509 = vmatprep.subr.bf16.mxu1 %v3060_v48 }
 0x329   : > { %2517 = vmatprep.subr.bf16.mxu0 %v3060_v48  ;;  %2511 = vmatprep.mubr.msk.bf16.mxu1 %vm3061_vm0, %v3060_v48  ;;  %v1196_v56 = vpop.permute.xlu0 %1195 }
 0x32a   : > { %2519 = vmatprep.mubr.msk.bf16.mxu0 %vm3061_vm0, %v3060_v48 }
 0x32c   : > { %2518 = vmatpush3.bf16.msra.mxu0 %v2730_v53 }
 0x32d   : > { %2531 = vmatprep.subr.bf16.mxu0 %v3060_v48 }
 0x32f   : > { %2510 = vmatpush3.bf16.xpose.msra.mxu1 %v1424_v55 }
 0x330   : > { %2523 = vmatprep.subr.bf16.mxu1 %v3060_v48 }
 0x336   : > { %2512 = vmatmul.mubr.msk.bf16.vlgmr.msra.gmra.mxu1 %vm1239_vm2, %v1196_v56 }
 0x337   : > { %2527 = vmatprep.mubr.msk.bf16.mxu1 %vm3061_vm0, %v3060_v48 }
 0x373   : > { %v1283_v57 = vpop.f32.mrf.mxu1 }
 0x374   : > { %v1470_v58 = vsel %vm1239_vm2, %v1283_v57, -inf }
 0x375   : > { %v2489_v59 = vpop.f32.mrf.mxu1  ;;  %1471 = vmax.xlane.f32.xlu1 %v1470_v58 }
 0x377   : > { %v1286_v60 = vpop.f32.mrf.mxu1 }
 0x378   : > { %v1473_v61 = vsel %vm1239_vm2, %v1286_v60, -inf }
 0x379   : > { %v2490_v62 = vpop.f32.mrf.mxu1  ;;  %1474 = vmax.xlane.f32.xlu0 %v1473_v61 }
 0x3e6   : > { %v1343_v0 = vpop.f32.mrf.mxu1 }
 0x3e7   : > { %v1403_v1 = vpop.f32.mrf.mxu0  ;;  %v1476_v2 = vsel %vm1239_vm2, %v1343_v0, -inf }
 0x3e8   : > { %1477 = vmax.xlane.f32.xlu0 %v1476_v2  ;;  %v2497_v3 = vpop.f32.mrf.mxu1  ;;  %v1482_v4 = vsel %vm1239_vm2, %v1403_v1, -inf }
 0x3e9   : > { %1483 = vmax.xlane.f32.xlu1 %v1482_v4  ;;  %v2505_v6 = vpop.f32.mrf.mxu0 }
 0x3ea   : > { %v1346_v7 = vpop.f32.mrf.mxu1 }
 0x3eb   : > { %v1406_v8 = vpop.f32.mrf.mxu0  ;;  %v1479_v9 = vsel %vm1239_vm2, %v1346_v7, -inf }
 0x3ec   : > { %1480 = vmax.xlane.f32.xlu0 %v1479_v9  ;;  %v2498_v10 = vpop.f32.mrf.mxu1  ;;  %v1485_v12 = vsel %vm1239_vm2, %v1406_v8, -inf }
 0x3ed   : > { %v2506_v11 = vpop.f32.mrf.mxu0 }
 0x3f0   : > { %1486 = vmax.xlane.f32.xlu0 %v1485_v12 }
 0x3f6   : > { %v1463_v14 = vpop.f32.mrf.mxu1 }
 0x3f7   : > { %v1488_v15 = vsel %vm1239_vm2, %v1463_v14, -inf }
 0x3f8   : > { %v2513_v16 = vpop.f32.mrf.mxu1  ;;  %1489 = vmax.xlane.f32.xlu1 %v1488_v15 }
 0x3fa   : > { %v1466_v17 = vpop.f32.mrf.mxu1 }
 0x3fb   : > { %v1491_v18 = vsel %vm1239_vm2, %v1466_v17, -inf }
 0x3fc   : > { %v2514_v19 = vpop.f32.mrf.mxu1  ;;  %1492 = vmax.xlane.f32.xlu0 %v1491_v18 }
 0x3fe   : > { %v1472_v23 = vpop.xlane.xlu1 %1471 }
 0x3ff   : > { %v1494_v13 = vsub.f32 %v1283_v57, %v1472_v23 }
 0x401   : > { %v1502_v25 = vmul.f32 1.442695, %v1494_v13 }
 0x402   : > { %v1475_v21 = vpop.xlane.xlu0 %1474 }
 0x403   : > { %v1495_v22 = vsub.f32 %v1286_v60, %v1475_v21 }
 0x405   : > { %v1504_v24 = vmul.f32 1.442695, %v1495_v22 }
 0x407   : > { %2758 = vpow2.f32 %v1504_v24 }
 0x408   : > { %2760 = vpow2.f32 %v1502_v25 }
 0x409   : > { %959 = vrot.lane.b32.xlu1 %v3397_v63, %s3062_s28 }
 0x40d   : > { %963 = vrot.lane.b32.xlu1 %v3397_v63, %s3063_s30 }
 0x411   : > { %967 = vrot.lane.b32.xlu1 %v3397_v63, %s3064_s4 }
 0x412   : > { %957 = vrot.lane.b32.xlu0 %v3402_v5, %s3062_s28  ;;  %s2958_s28 = scalar_lea.vmem %s2957_s14, 512 }
 0x413   : > { %p2960_p1 = scmp.lt.s32.totalorder %s2958_s28, %s2952_s15 }
 0x414   : > { %v3475_v20 = vpop.eup %2758 }
 0x415   : > { %v1521_v26 = vsel %vm1239_vm2, %v3475_v20, 0.0  ;;  %v3479_v29 = vpop.eup %2760  ;;  %p2961_p9 = por %p2960_p1, %p2959_p7 }
 0x416   : > { %v1518_v63 = vsel %vm1239_vm2, %v3479_v29, 0.0 }
 0x417   : > { %p2962_p8 = pnand %p2961_p9, %p2955_p12 }
 0x431   : > { %1522 = vadd.xlane.f32.xlu0 %v1521_v26 }
 0x435   : > { %1519 = vadd.xlane.f32.xlu1 %v1518_v63 }
 0x471   : > { %v1478_v30 = vpop.xlane.xlu0 %1477 }
 0x472   : > { %v1496_v31 = vsub.f32 %v1343_v0, %v1478_v30  ;;  %v1484_v32 = vpop.xlane.xlu1 %1483 }
 0x473   : > { %v1498_v33 = vsub.f32 %v1403_v1, %v1484_v32 }
 0x474   : > { %v1506_v34 = vmul.f32 1.442695, %v1496_v31 }
 0x475   : > { %v1510_v35 = vmul.f32 1.442695, %v1498_v33  ;;  %v1481_v36 = vpop.xlane.xlu0 %1480 }
 0x476   : > { %2762 = vpow2.f32 %v1506_v34  ;;  %v1497_v37 = vsub.f32 %v1346_v7, %v1481_v36 }
 0x477   : > { %2764 = vpow2.f32 %v1510_v35 }
 0x478   : > { %v1508_v38 = vmul.f32 1.442695, %v1497_v37 }
 0x479   : > { %v1487_v39 = vpop.xlane.xlu0 %1486 }
 0x47a   : > { %2766 = vpow2.f32 %v1508_v38  ;;  %v1499_v40 = vsub.f32 %v1406_v8, %v1487_v39 }
 0x47c   : > { %v1512_v41 = vmul.f32 1.442695, %v1499_v40 }
 0x47e   : > { %2768 = vpow2.f32 %v1512_v41 }
 0x481   : > { %v1490_v27 = vpop.xlane.xlu1 %1489 }
 0x482   : > { %v1500_v28 = vsub.f32 %v1463_v14, %v1490_v27 }
 0x483   : > { %v3483_v42 = vpop.eup %2762 }
 0x484   : > { %v1514_v43 = vmul.f32 1.442695, %v1500_v28  ;;  %v1524_v44 = vsel %vm1239_vm2, %v3483_v42, 0.0  ;;  %v3487_v45 = vpop.eup %2764  ;;  %v2738_v28 = vld [vmem:[#allocation13 + $0x8] sm:$0xff]  }
 0x485   : > { %v1493_v46 = vpop.xlane.xlu0 %1492  ;;  %v960_v47 = vpop.permute.xlu1 %959  ;;  %1525 = vadd.xlane.f32.xlu1 %v1524_v44  ;;  %v1530_v55 = vsel %vm1239_vm2, %v3487_v45, 0.0 }
 0x486   : > { %2770 = vpow2.f32 %v1514_v43  ;;  %v1501_v49 = vsub.f32 %v1466_v17, %v1493_v46  ;;  %v2275_v50 = vcombine.low %v960_v47, %v960_v47  ;;  %v2276_v51 = vcombine.high %v960_v47, %v960_v47 }
 0x487   : > { %v3489_v52 = vpop.eup %2766 }
 0x488   : > { %v1516_v53 = vmul.f32 1.442695, %v1501_v49  ;;  %1023 = vst.msk [vmem:[#allocation3 + $0x18] sm:$0xf] %vm938_vm1, %v2275_v50  ;;  %1024 = vst.msk [vmem:[#allocation3 + $0x1c] sm:$0xf] %vm938_vm1, %v2276_v51 }
 0x489   : > { %v1527_v54 = vsel %vm1239_vm2, %v3489_v52, 0.0  ;;  %v958_v56 = vpop.permute.xlu0 %957  ;;  %v964_v57 = vpop.permute.xlu1 %963  ;;  %1531 = vadd.xlane.f32.xlu1 %v1530_v55  ;;  %v2739_v49 = vld [vmem:[#allocation13] sm:$0xff]   ;;  %v2741_v51 = vld [vmem:[#allocation13 + $0x10] sm:$0xff]   ;;  %v2742_v55 = vld [vmem:[#allocation13 + $0x28] sm:$0xff]  }
 0x48a   : > { %1528 = vadd.xlane.f32.xlu0 %v1527_v54  ;;  %2772 = vpow2.f32 %v1516_v53  ;;  %v2273_v58 = vcombine.low %v958_v56, %v958_v56  ;;  %v2274_v59 = vcombine.high %v958_v56, %v958_v56  ;;  %v2279_v60 = vcombine.low %v964_v57, %v964_v57 }
 0x48b   : > { %v3497_v61 = vpop.eup %2768  ;;  %v2280_v62 = vcombine.high %v964_v57, %v964_v57 }
 0x48c   : > { %1021 = vst.msk [vmem:[#allocation3 + $0x10] sm:$0xf] %vm938_vm1, %v2273_v58  ;;  %1022 = vst.msk [vmem:[#allocation3 + $0x14] sm:$0xf] %vm938_vm1, %v2274_v59  ;;  %v1533_v0 = vsel %vm1239_vm2, %v3497_v61, 0.0  ;;  %v2743_v58 = vld [vmem:[#allocation13 + $0x20] sm:$0xff]  }
 0x48d   : > { %1027 = vst.msk [vmem:[#allocation3 + $0x28] sm:$0xf] %vm938_vm1, %v2279_v60  ;;  %1028 = vst.msk [vmem:[#allocation3 + $0x2c] sm:$0xf] %vm938_vm1, %v2280_v62  ;;  %v968_v1 = vpop.permute.xlu1 %967  ;;  %v2744_v62 = vld [vmem:[#allocation13 + $0x38] sm:$0xff]  }
 0x48e   : > { %1534 = vadd.xlane.f32.xlu0 %v1533_v0  ;;  %v2283_v2 = vcombine.low %v968_v1, %v968_v1  ;;  %v2284_v3 = vcombine.high %v968_v1, %v968_v1 }
 0x48f   : > { %v2732_v4 = vld [vmem:[#allocation3 + $0x18] sm:$0xff]  }
 0x490   : > { %1031 = vst.msk [vmem:[#allocation3 + $0x38] sm:$0xf] %vm938_vm1, %v2283_v2  ;;  %1032 = vst.msk [vmem:[#allocation3 + $0x3c] sm:$0xf] %vm938_vm1, %v2284_v3  ;;  %2524 = vmatpush3.bf16.msra.mxu1 %v2732_v4  ;;  %v2745_v2 = vld [vmem:[#allocation13 + $0x30] sm:$0xff]  }
 0x491   : > { %2525 = vmatprep.subr.bf16.mxu1 %v3060_v48 }
 0x493   : > { %v3508_v6 = vpop.eup %2770  ;;  %v2733_v7 = vld [vmem:[#allocation3 + $0x10] sm:$0xff]  }
 0x494   : > { %v1536_v8 = vsel %vm1239_vm2, %v3508_v6, 0.0  ;;  %2526 = vmatpush3.bf16.msra.mxu1 %v2733_v7  ;;  %v2734_v19 = vld [vmem:[#allocation3 + $0x28] sm:$0xff]  }
 0x495   : > { %1537 = vadd.xlane.f32.xlu1 %v1536_v8  ;;  %2539 = vmatprep.subr.bf16.mxu1 %v3060_v48 }
 0x497   : > { %v3513_v9 = vpop.eup %2772  ;;  %v2735_v33 = vld [vmem:[#allocation3 + $0x38] sm:$0xff]  }
 0x498   : > { %v1539_v10 = vsel %vm1239_vm2, %v3513_v9, 0.0 }
 0x499   : > { %1540 = vadd.xlane.f32.xlu0 %v1539_v10 }
 0x4a6   : > { %961 = vrot.lane.b32.xlu1 %v3402_v5, %s3063_s30 }
 0x4af   : > { %965 = vrot.lane.b32.xlu0 %v3402_v5, %s3064_s4 }
 0x4ba   : > { %v1523_v11 = vpop.xlane.xlu0 %1522 }
 0x4bb   : > { %2774 = vrcp.f32 %v1523_v11 }
 0x4be   : > { %v1520_v12 = vpop.xlane.xlu1 %1519 }
 0x4bf   : > { %2776 = vrcp.f32 %v1520_v12 }
 0x4c8   : > { %v2775_v14 = vpop.eup %2774 }
 0x4c9   : > { %v1551_v17 = vmul.f32 %v2775_v14, %v3475_v20 }
 0x4cc   : > { %v2777_v15 = vpop.eup %2776 }
 0x4cd   : > { %v1550_v16 = vmul.f32 %v2777_v15, %v3479_v29 }
 0x4cf   : > { %v1558_v18 = vpack.c.bf16 %v1551_v17, %v1550_v16 }
 0x4d1   : > { %2520 = vmatmul.mubr.msk.bf16.vlgmr.msra.gmra.mxu0 %vm1239_vm2, %v1558_v18 }
 0x4d2   : > { %2532 = vmatpush3.bf16.msra.mxu0 %v2734_v19  ;;  %2535 = vmatprep.mubr.msk.bf16.mxu0 %vm3061_vm0, %v3060_v48 }
 0x4d3   : > { %2533 = vmatprep.subr.bf16.mxu0 %v3060_v48 }
 0x50e   : > { %v1526_v5 = vpop.xlane.xlu1 %1525 }
 0x50f   : > { %2778 = vrcp.f32 %v1526_v5 }
 0x512   : > { %v1532_v23 = vpop.xlane.xlu1 %1531 }
 0x513   : > { %v1529_v21 = vpop.xlane.xlu0 %1528 }
 0x514   : > { %2780 = vrcp.f32 %v1529_v21 }
 0x517   : > { %v1535_v22 = vpop.xlane.xlu0 %1534 }
 0x518   : > { %2782 = vrcp.f32 %v1535_v22 }
 0x519   : > { %2784 = vrcp.f32 %v1532_v23 }
 0x51c   : > { %v2779_v13 = vpop.eup %2778 }
 0x51d   : > { %v1552_v20 = vmul.f32 %v2779_v13, %v3483_v42 }
 0x51e   : > { %v1538_v24 = vpop.xlane.xlu1 %1537 }
 0x51f   : > { %2786 = vrcp.f32 %v1538_v24 }
 0x521   : > { %v2781_v25 = vpop.eup %2780 }
 0x522   : > { %v1553_v26 = vmul.f32 %v2781_v25, %v3489_v52  ;;  %v1541_v29 = vpop.xlane.xlu0 %1540  ;;  %v962_v63 = vpop.permute.xlu1 %961 }
 0x523   : > { %2788 = vrcp.f32 %v1541_v29  ;;  %v2277_v30 = vcombine.low %v962_v63, %v962_v63  ;;  %v2278_v31 = vcombine.high %v962_v63, %v962_v63 }
 0x524   : > { %v1559_v32 = vpack.c.bf16 %v1553_v26, %v1552_v20  ;;  %v2330_v26 = vld [vmem:[%s3680_s8] ss:$0 sm:$0xff] }
 0x525   : > { %1025 = vst.msk [vmem:[#allocation3 + $0x20] sm:$0xf] %vm938_vm1, %v2277_v30  ;;  %1026 = vst.msk [vmem:[#allocation3 + $0x24] sm:$0xf] %vm938_vm1, %v2278_v31  ;;  %v2783_v37 = vpop.eup %2782 }
 0x526   : > { %2528 = vmatmul.mubr.msk.bf16.vlgmr.msra.gmra.mxu1 %vm1239_vm2, %v1559_v32  ;;  %v966_v34 = vpop.permute.xlu0 %965  ;;  %v2785_v38 = vpop.eup %2784  ;;  %v1555_v39 = vmul.f32 %v2783_v37, %v3497_v61 }
 0x527   : > { %2540 = vmatpush3.bf16.msra.mxu1 %v2735_v33  ;;  %2543 = vmatprep.mubr.msk.bf16.mxu1 %vm3061_vm0, %v3060_v48  ;;  %v2281_v35 = vcombine.low %v966_v34, %v966_v34  ;;  %v2282_v36 = vcombine.high %v966_v34, %v966_v34  ;;  %v1554_v41 = vmul.f32 %v2785_v38, %v3487_v45  ;;  %v2740_v45 = vld [vmem:[#allocation13 + $0x18] sm:$0xff]  }
 0x528   : > { %2541 = vmatprep.subr.bf16.mxu1 %v3060_v48 }
 0x529   : > { %1029 = vst.msk [vmem:[#allocation3 + $0x30] sm:$0xf] %vm938_vm1, %v2281_v35  ;;  %1030 = vst.msk [vmem:[#allocation3 + $0x34] sm:$0xf] %vm938_vm1, %v2282_v36  ;;  %v1560_v42 = vpack.c.bf16 %v1555_v39, %v1554_v41  ;;  %v2790_v35 = vld [vmem:[%s3309_s16] sm:$0xff] }
 0x52c   : > { %v2736_v40 = vld [vmem:[#allocation3 + $0x20] sm:$0xff]   ;;  %v2787_v27 = vpop.eup %2786 }
 0x52d   : > { %2534 = vmatpush3.bf16.msra.mxu0 %v2736_v40  ;;  %v1556_v46 = vmul.f32 %v2787_v27, %v3508_v6  ;;  %v2791_v40 = vld [vmem:[%s3309_s16 + $0x8] sm:$0xff] }
 0x52e   : > { %2547 = vmatprep.subr.bf16.mxu0 %v3060_v48 }
 0x530   : > { %v2789_v43 = vpop.eup %2788  ;;  %v2737_v44 = vld [vmem:[#allocation3 + $0x30] sm:$0xff]   ;;  %2536 = vmatmul.mubr.msk.bf16.vlgmr.msra.gmra.mxu0 %vm1239_vm2, %v1560_v42 }
 0x531   : > { %v1557_v47 = vmul.f32 %v2789_v43, %v3513_v9  ;;  %2542 = vmatpush3.bf16.msra.mxu1 %v2737_v44  ;;  %2548 = vmatpush3.bf16.msra.mxu0 %v2738_v28 }
 0x532   : > { %2549 = vmatprep.subr.bf16.mxu0 %v3060_v48  ;;  %2551 = vmatprep.mubr.msk.bf16.mxu0 %vm3061_vm0, %v3060_v48 }
 0x533   : > { %v1561_v50 = vpack.c.bf16 %v1557_v47, %v1556_v46  ;;  %2555 = vmatprep.subr.bf16.mxu1 %v3060_v48 }
 0x535   : > { %2544 = vmatmul.mubr.msk.bf16.vlgmr.msra.gmra.mxu1 %vm1239_vm2, %v1561_v50  ;;  %2550 = vmatpush3.bf16.msra.mxu0 %v2739_v49 }
 0x536   : > { %2559 = vmatprep.mubr.msk.bf16.mxu1 %vm3061_vm0, %v3060_v48  ;;  %2563 = vmatprep.subr.bf16.mxu0 %v3060_v48 }
 0x537   : > { %2556 = vmatpush3.bf16.msra.mxu1 %v2740_v45 }
 0x538   : > { %2557 = vmatprep.subr.bf16.mxu1 %v3060_v48 }
 0x53b   : > { %2558 = vmatpush3.bf16.msra.mxu1 %v2741_v51 }
 0x53c   : > { %2571 = vmatprep.subr.bf16.mxu1 %v3060_v48 }
 0x591   : > { %v1611_v52 = vpop.f32.mrf.mxu0 }
 0x593   : > { %v2521_v53 = vpop.f32.mrf.mxu0 }
 0x595   : > { %v1614_v54 = vpop.f32.mrf.mxu0 }
 0x596   : > { %v1786_v56 = vpack.c.bf16 %v1614_v54, %v1611_v52 }
 0x597   : > { %v2522_v57 = vpop.f32.mrf.mxu0 }
 0x598   : > { %2552 = vmatmul.mubr.msk.bf16.vlgmr.msra.gmra.mxu0 %vm1239_vm2, %v1786_v56 }
 0x599   : > { %2564 = vmatpush3.bf16.msra.mxu0 %v2742_v55  ;;  %2567 = vmatprep.mubr.msk.bf16.mxu0 %vm3061_vm0, %v3060_v48 }
 0x59a   : > { %2565 = vmatprep.subr.bf16.mxu0 %v3060_v48 }
 0x59d   : > { %2566 = vmatpush3.bf16.msra.mxu0 %v2743_v58 }
 0x5e6   : > { %v1667_v59 = vpop.f32.mrf.mxu1 }
 0x5e8   : > { %v2529_v60 = vpop.f32.mrf.mxu1 }
 0x5ea   : > { %v1670_v61 = vpop.f32.mrf.mxu1 }
 0x5eb   : > { %v1787_v0 = vpack.c.bf16 %v1670_v61, %v1667_v59 }
 0x5ec   : > { %v2530_v1 = vpop.f32.mrf.mxu1 }
 0x5ed   : > { %2560 = vmatmul.mubr.msk.bf16.vlgmr.msra.gmra.mxu1 %vm1239_vm2, %v1787_v0 }
 0x5ee   : > { %2572 = vmatpush3.bf16.msra.mxu1 %v2744_v62  ;;  %2575 = vmatprep.mubr.msk.bf16.mxu1 %vm3061_vm0, %v3060_v48 }
 0x5ef   : > { %2573 = vmatprep.subr.bf16.mxu1 %v3060_v48 }
 0x5f0   : > { %v1723_v3 = vpop.f32.mrf.mxu0 }
 0x5f2   : > { %2574 = vmatpush3.bf16.msra.mxu1 %v2745_v2  ;;  %v2537_v4 = vpop.f32.mrf.mxu0 }
 0x5f4   : > { %v1726_v6 = vpop.f32.mrf.mxu0 }
 0x5f5   : > { %v1779_v7 = vpop.f32.mrf.mxu1  ;;  %v1788_v8 = vpack.c.bf16 %v1726_v6, %v1723_v3 }
 0x5f6   : > { %v2538_v9 = vpop.f32.mrf.mxu0 }
 0x5f7   : > { %v2545_v10 = vpop.f32.mrf.mxu1  ;;  %2568 = vmatmul.mubr.msk.bf16.vlgmr.msra.gmra.mxu0 %vm1239_vm2, %v1788_v8 }
 0x5f9   : > { %v1782_v11 = vpop.f32.mrf.mxu1 }
 0x5fa   : > { %v1789_v12 = vpack.c.bf16 %v1782_v11, %v1779_v7 }
 0x5fb   : > { %v2546_v14 = vpop.f32.mrf.mxu1 }
 0x5fc   : > { %2576 = vmatmul.mubr.msk.bf16.vlgmr.msra.gmra.mxu1 %vm1239_vm2, %v1789_v12 }
 0x658   : > { %v1855_v15 = vpop.f32.mrf.mxu0 }
 0x65a   : > { %v2553_v16 = vpop.f32.mrf.mxu0 }
 0x65c   : > { %v1858_v17 = vpop.f32.mrf.mxu0 }
 0x65e   : > { %v2554_v18 = vpop.f32.mrf.mxu0 }
 0x6ad   : > { %v1911_v48 = vpop.f32.mrf.mxu1 }
 0x6ae   : > { %v2030_v23 = vadd.f32 %v1911_v48, %v1855_v15 }
 0x6af   : > { %v2561_v19 = vpop.f32.mrf.mxu1 }
 0x6b1   : > { %v1914_v5 = vpop.f32.mrf.mxu1 }
 0x6b2   : > { %v2033_v29 = vadd.f32 %v1914_v5, %v1858_v17 }
 0x6b3   : > { %v2562_v21 = vpop.f32.mrf.mxu1 }
 0x6b7   : > { %v1967_v22 = vpop.f32.mrf.mxu0 }
 0x6b8   : > { %v2031_v24 = vadd.f32 %v2030_v23, %v1967_v22 }
 0x6b9   : > { %v2569_v13 = vpop.f32.mrf.mxu0 }
 0x6bb   : > { %v1970_v25 = vpop.f32.mrf.mxu0 }
 0x6bc   : > { %v2023_v20 = vpop.f32.mrf.mxu1  ;;  %v2034_v32 = vadd.f32 %v2033_v29, %v1970_v25 }
 0x6bd   : > { %v2032_v63 = vadd.f32 %v2031_v24, %v2023_v20  ;;  %v2570_v30 = vpop.f32.mrf.mxu0 }
 0x6be   : > { %v2577_v31 = vpop.f32.mrf.mxu1 }
 0x6bf   : > { %v2043_v33 = vadd.f32 %v2330_v26, %v2032_v63 }
 0x6c0   : > { %v2026_v34 = vpop.f32.mrf.mxu1 }
 0x6c1   : > { %v2045_v36 = vadd.f32 %v2790_v35, %v2043_v33  ;;  %v2035_v37 = vadd.f32 %v2034_v32, %v2026_v34 }
 0x6c2   : > { %v2578_v38 = vpop.f32.mrf.mxu1 }
 0x6c3   : > { %2047 = vst [vmem:[%s547_s13] sm:$0xff] %v2045_v36  ;;  %v2044_v39 = vadd.f32 %v2330_v26, %v2035_v37 }
 0x6c5   : > { %v2046_v41 = vadd.f32 %v2791_v40, %v2044_v39 }
 0x6c7   : > { %2048 = vst [vmem:[%s547_s13 + $0x8] sm:$0xff] %v2046_v41 }
 0x6c8   : > { %2965 = shalt.err (!%p2962_p8)
}
 0x6c9   : > { %s2966_s16 = scalar_lea.hbm %s3574_s21, 256  ;;  %s2970_s6 = scalar_lea.hbm %s3682_s20, 512 }
 0x6ca   : > { %p2967_p2 = scmp.ne.s32.totalorder %s3574_s21, %s2966_s16  ;;  %p2971_p11 = scmp.lt.s32.totalorder %s3574_s21, %s3682_s20 }
 0x6cb   : > { %p2972_p5 = scmp.lt.s32.totalorder %s2970_s6, %s2966_s16 }
 0x6cc   : > { %p2968_p3 = pnand %p2967_p2, %p3252_p0 }
 0x6cd   : > { %p2973_p4 = por %p2972_p5, %p2971_p11 }
 0x6ce   : > { %p2969_p13 = pneg %p2968_p3 }
 0x6d0   : > { %p2974_p10 = pnand %p2973_p4, %p2969_p13 }
 0x6d2   : > { %2977 = shalt.err (!%p2974_p10)
}
 0x6d3   : > { %s3066_s23 = smov 128   ;;  %s3067_s8 = smov 8  }
 0x6d4   : > { %2599 = dma.vmem_to_hbm [thread:$0]  (%p3252_p0), %s3569_s12, 256, %s3574_s21, %s2050_s11, %s3066_s23, %s3066_s23, %s3067_s8  }
 0x6d5 PF: > { %s3683_s13 = sld [smem:[#allocation22_spill]]  ;;  %p3685_p12 = scmp.ge.s32.totalorder %s3048_s26, 2 }
 0x6d7   : > { %p2622_p7 = pnand %p3685_p12, %p3178_p6 }
 0x6d9   : > { %p2623_p1 = pneg %p2622_p7 }
 0x6db   : > { %s2080_s18 = sand.u32 1, %s3683_s13  }
 0x6dc   : > { %s2081_s19 = scalar_lea.sflag [#allocation6], %s2080_s18 }
 0x6dd   : > { %3023 = dma.done.wait (%p2623_p1), %s2081_s19, 256  }
 0x6de   : > { %3025 = vsyncadd (%p2623_p1), %s2081_s19, 4294967040  ;;  %s33_s26 = sadd.s32 1, %s3048_s26   ;;  %s3686_s15 = sld [smem:[#allocation23_spill]] }
 0x6df   : > { %p30_p9 = scmp.ge.s32.totalorder %s33_s26, 4   ;;  %s3687_s23 = sld [smem:[#allocation27_spill]] }
 0x6e0   : > { %s3688_s17 = sld [smem:[#allocation25_spill]]  ;;  %s3689_s21 = smov %s3032_s22 }
 0x6e1   : > { %s3691_s24 = smov %s3044_s25 }
 0x6e2   :  { %32 = sbr.rel (!%p30_p9) target bundleno = 18 (0x12), region = 146 }
 0x6e4   : > { %s3690_s22 = smov %s3686_s15 }
 0x6e6   : > { %s3692_s25 = smov %s3688_s17 }
 0x6e7   :  { %2086 = vsyncpa [#allocation5], 1 }
 0x6e8   :  { %2088 = vsyncpa [#allocation5 + $0x1], 1 }
 0x6e9   :  { %2089 = vsyncpa [#allocation8], 1 }
 0x6ea   :  { %2091 = vsyncpa [#allocation8 + $0x1], 1 }
 0x6eb   :  { %2092 = vsyncpa [#allocation11], 1 }
 0x6ec   :  { %2093 = vsyncpa [#allocation14], 1 }
 0x6ed   :  { %2094 = vsyncpa [#allocation6], 1 }
 0x6ee   :  { %2096 = vsyncpa [#allocation6 + $0x1], 1 }

</bundles_post_ra>
